<compile_context>
chip_gen: v7x
topology: tpu7x:2x2x1
jax: 0.10.0
libtpu: 0.0.40
codegen_flags: <defaults>
</compile_context>

<pallas_src>
import jax
import jax.numpy as jnp
from jax.experimental import pallas as pl
from jax.experimental.pallas import tpu as pltpu

_TM_ROWS = 2048                      # rows of the (im2col) LHS matrix per grid step
_VMEM_LIMIT = 32 * 1024 * 1024       # explicit: v5e's default scoped limit is only 16 MiB


def _round_up(x, m):
    return (x + m - 1) // m * m


# --------------- Pass 1: tiled bf16 matmul (MXU) + per-tile batch statistics -----------------

def _matmul_stats_kernel(lhs_ref, w_ref, o_ref, sum_ref, sq_ref):
    # f32 accumulation on the MXU; stats are taken from the f32 acc, output stored in bf16.
    acc = jnp.dot(lhs_ref[...], w_ref[...], preferred_element_type=jnp.float32)  # [TM, Cout]
    o_ref[...] = acc.astype(o_ref.dtype)
    # Per-tile partials (zero-padded rows contribute exactly 0 to both sums).
    sum_ref[...] = jnp.sum(acc, axis=0).reshape(1, 1, -1)
    sq_ref[...] = jnp.sum(acc * acc, axis=0).reshape(1, 1, -1)


# --------------- Pass 2: elementwise BN (folded scale/shift) + ReLU ---------------------------

def _bn_relu_kernel(x_ref, scale_ref, shift_ref, o_ref):
    y = x_ref[...].astype(jnp.float32) * scale_ref[...] + shift_ref[...]
    o_ref[...] = jnp.maximum(y, 0.0).astype(o_ref.dtype)


def _apply_bn_relu(conv_out, scale, shift, m, tm, num_tiles, cout):
    """BN+ReLU over a (mp, cout) bf16 intermediate; returns bf16 (m, cout)."""
    mp = conv_out.shape[0]
    if cout % 128 == 0:
        # already lane-dense
        work, cols, reps = conv_out, cout, 1
    elif 128 % cout == 0 and (tm * cout) % 128 == 0:
        # present the stream as a lane-dense 128-wide slab (identical row-major layout)
        work, cols, reps = conv_out.reshape(mp * cout // 128, 128), 128, 128 // cout
    else:
        work, cols, reps = conv_out, cout, 1   # masked stores; correct, just slower

    rows = work.shape[0]
    tile_rows = rows // num_tiles
    scale_w = jnp.tile(scale.reshape(1, cout).astype(jnp.float32), (1, reps))
    shift_w = jnp.tile(shift.reshape(1, cout).astype(jnp.float32), (1, reps))

    out = pl.pallas_call(
        _bn_relu_kernel,
        out_shape=jax.ShapeDtypeStruct((rows, cols), jnp.bfloat16),
        grid=(num_tiles,),
        in_specs=[
            pl.BlockSpec((tile_rows, cols), lambda i: (i, 0)),
            pl.BlockSpec((1, cols), lambda i: (0, 0)),
            pl.BlockSpec((1, cols), lambda i: (0, 0)),
        ],
        out_specs=pl.BlockSpec((tile_rows, cols), lambda i: (i, 0)),
        compiler_params=pltpu.CompilerParams(
            dimension_semantics=("parallel",),
            vmem_limit_bytes=_VMEM_LIMIT,
        ),
    )(work, scale_w, shift_w)
    return out.reshape(mp, cout)[:m]


# --------------- Host-side glue ----------------------------------------------------------------

def _im2col(x_nhwc, kh, kw, stride, pad):
    # x_nhwc: [N, H, W, C] -> patches [N*Ho*Wo, kh*kw*C], feature order (kh, kw, C).
    x = jnp.pad(x_nhwc, ((0, 0), (pad, pad), (pad, pad), (0, 0)))
    n, hp, wp, c = x.shape
    ho = (hp - kh) // stride + 1
    wo = (wp - kw) // stride + 1
    cols = []
    for i in range(kh):
        for j in range(kw):
            cols.append(x[:, i:i + stride * ho:stride, j:j + stride * wo:stride, :])
    patches = jnp.stack(cols, axis=-2)                       # [N, Ho, Wo, kh*kw, C]
    return patches.reshape(n * ho * wo, kh * kw * c), (n, ho, wo)


def conv_bn_relu(x_nhwc, w_oihw, gamma, beta, stride, pad, eps=1e-5):
    """Conv (no bias) + training-mode BN + ReLU. Input/output activations are bf16 NHWC."""
    cout, cin, kh, kw = w_oihw.shape
    x = x_nhwc.astype(jnp.bfloat16)   # no-op when the previous layer already produced bf16

    if kh == 1 and kw == 1 and stride == 1 and pad == 0:
        # 1x1 conv: the activation already *is* the LHS matrix; K=Cin stays un-padded
        # (full-extent block), so no padded copy of the activation is made.
        n, h, w_sp, c = x.shape
        lhs = x.reshape(n * h * w_sp, c)
        ho, wo = h, w_sp
        k = kp = c
    else:
        # TODO(synk): implicit-GEMM / space-to-depth fusion to avoid materializing this
        # kh*kw-replicated patch matrix in HBM (largest remaining HBM-traffic term).
        lhs, (n, ho, wo) = _im2col(x, kh, kw, stride, pad)
        k = lhs.shape[1]
        kp = _round_up(k, 128)

    m = lhs.shape[0]
    tm = min(_TM_ROWS, _round_up(m, 16))   # bf16 sublane packing -> multiple of 16
    mp = _round_up(m, tm)
    num_tiles = mp // tm

    lhs_p = jnp.pad(lhs, ((0, mp - m), (0, kp - k)))
    # Weight matrix: (kh, kw, Cin) x Cout, padded in K only (Cout stays un-padded; the
    # MXU simply runs a <=128-wide RHS, which is not the bottleneck here).
    wmat = jnp.transpose(w_oihw, (2, 3, 1, 0)).reshape(k, cout).astype(jnp.bfloat16)
    w_p = jnp.pad(wmat, ((0, kp - k), (0, 0)))

    conv_out, part_sum, part_sq = pl.pallas_call(
        _matmul_stats_kernel,
        out_shape=(
            jax.ShapeDtypeStruct((mp, cout), jnp.bfloat16),          # pre-BN conv output
            jax.ShapeDtypeStruct((num_tiles, 1, cout), jnp.float32),  # per-tile sum(x)
            jax.ShapeDtypeStruct((num_tiles, 1, cout), jnp.float32),  # per-tile sum(x^2)
        ),
        grid=(num_tiles,),
        in_specs=[
            pl.BlockSpec((tm, kp), lambda i: (i, 0)),    # M-tiled, double-buffered DMA
            pl.BlockSpec((kp, cout), lambda i: (0, 0)),  # weights resident across grid
        ],
        out_specs=(
            pl.BlockSpec((tm, cout), lambda i: (i, 0)),
            pl.BlockSpec((1, 1, cout), lambda i: (i, 0, 0)),
            pl.BlockSpec((1, 1, cout), lambda i: (i, 0, 0)),
        ),
        compiler_params=pltpu.CompilerParams(
            dimension_semantics=("parallel",),           # per-tile outputs -> megacore OK
            vmem_limit_bytes=_VMEM_LIMIT,
        ),
    )(lhs_p, w_p)

    # Numerically stable (Chan-style) merge of per-tile statistics. Padded rows are zeros,
    # so per-tile sums only contain real rows; `counts` carries the true per-tile row count.
    sums = part_sum[:, 0, :]                                              # (T, Cout)
    sqs = part_sq[:, 0, :]
    counts = jnp.minimum(tm, m - jnp.arange(num_tiles) * tm).astype(jnp.float32)[:, None]
    mean_t = sums / counts
    m2_t = jnp.maximum(sqs - sums * mean_t, 0.0)
    mean = jnp.sum(sums, axis=0) / m                                      # (Cout,)
    m2 = jnp.sum(m2_t, axis=0) + jnp.sum(counts * (mean_t - mean[None, :]) ** 2, axis=0)
    var = jnp.maximum(m2 / m, 0.0)                                        # biased variance

    scale = gamma * jax.lax.rsqrt(var + eps)
    shift = beta - mean * scale

    out = _apply_bn_relu(conv_out, scale, shift, m, tm, num_tiles, cout)
    return out.reshape(n, ho, wo, cout)


def init_spatial_path_params(key, in_planes, out_planes):
    inner = 64
    layer_defs = [
        (in_planes, inner, 7),   # conv_7x7
        (inner, inner, 3),       # conv_3x3_1
        (inner, inner, 3),       # conv_3x3_2
        (inner, out_planes, 1),  # conv_1x1
    ]
    params = []
    for i, (cin, cout, k) in enumerate(layer_defs):
        kw_, kg_, kb_ = jax.random.split(jax.random.fold_in(key, i), 3)
        w = 0.1 * jax.random.normal(kw_, (cout, cin, k, k), jnp.float32)      # OIHW, no bias
        gamma = 1.0 + 0.1 * jax.random.normal(kg_, (cout,), jnp.float32)
        beta = 0.1 * jax.random.normal(kb_, (cout,), jnp.float32)
        params.append((w, gamma, beta))
    return params


def spatial_path(x_nchw, params):
    # x_nchw: [N, C, H, W] (PyTorch layout) -> output [N, out_planes, H/8, W/8] in f32.
    x = jnp.transpose(x_nchw, (0, 2, 3, 1)).astype(jnp.bfloat16)  # NCHW -> NHWC, bf16 once
    layer_cfg = [(2, 3), (2, 1), (2, 1), (1, 0)]                  # (stride, pad) per layer
    for (w, g, b), (stride, pad) in zip(params, layer_cfg):
        x = conv_bn_relu(x, w, g, b, stride, pad)                 # chains in bf16
    return jnp.transpose(x, (0, 3, 1, 2)).astype(jnp.float32)     # single f32 cast at the end


def _reference_spatial_path(x_nchw, params, eps=1e-5):
    # Pure-JAX reference matching the kernel pipeline's numerics: conv with bf16 operands
    # and f32 accumulation, BN stats from the f32 conv output, pre-BN activations stored in
    # bf16, BN+ReLU in f32, layer outputs chained in bf16, final output cast to f32.
    x = jnp.transpose(x_nchw, (0, 2, 3, 1)).astype(jnp.bfloat16)
    layer_cfg = [(2, 3), (2, 1), (2, 1), (1, 0)]
    for (w, g, b), (stride, pad) in zip(params, layer_cfg):
        w_hwio = jnp.transpose(w, (2, 3, 1, 0)).astype(jnp.bfloat16)
        y = jax.lax.conv_general_dilated(
            x, w_hwio, window_strides=(stride, stride),
            padding=[(pad, pad), (pad, pad)],
            dimension_numbers=("NHWC", "HWIO", "NHWC"),
            preferred_element_type=jnp.float32)
        mean = jnp.mean(y, axis=(0, 1, 2), keepdims=True)
        var = jnp.mean((y - mean) ** 2, axis=(0, 1, 2), keepdims=True)
        y_q = y.astype(jnp.bfloat16).astype(jnp.float32)      # bf16 pre-BN intermediate
        y_bn = (y_q - mean) * jax.lax.rsqrt(var + eps) * g + b
        x = jnp.maximum(y_bn, 0.0).astype(jnp.bfloat16)
    return jnp.transpose(x, (0, 3, 1, 2)).astype(jnp.float32)


if __name__ == "__main__":
    key = jax.random.PRNGKey(0)
    in_planes, out_planes = 4, 32
    x = jax.random.normal(jax.random.fold_in(key, 100), (2, in_planes, 16, 16), jnp.float32)

    params = init_spatial_path_params(key, in_planes, out_planes)

    out = jax.block_until_ready(jax.jit(spatial_path)(x, params))
    ref = jax.block_until_ready(jax.jit(_reference_spatial_path)(x, params))

    assert out.shape == (2, out_planes, 2, 2), out.shape
    # bf16 intermediates admit occasional 1-ulp divergences between the MXU-tiled matmul
    # and XLA's conv before the bf16 rounding of the pre-BN activation, hence 1e-2.
    assert jnp.allclose(out, ref, atol=1e-2, rtol=1e-2), float(jnp.max(jnp.abs(out - ref)))

    print("KERNEL_OK")
</pallas_src>

<mosaic_0001>
module attributes {stable_mosaic.version = 11 : i64} {
  func.func @_matmul_stats_kernel(%arg0: i32, %arg1: memref<128x256xbf16, #tpu.memory_space<vmem>>, %arg2: memref<256x64xbf16, #tpu.memory_space<vmem>>, %arg3: memref<128x64xbf16, #tpu.memory_space<vmem>>, %arg4: memref<1x1x64xf32, #tpu.memory_space<vmem>>, %arg5: memref<1x1x64xf32, #tpu.memory_space<vmem>>) attributes {dimension_semantics = [#tpu.dimension_semantics<parallel>], iteration_bounds = array<i64: 1>, scalar_prefetch = 0 : i64, scratch_operands = 0 : i64, tpu.core_type = #tpu.core_type<tc>, window_params = [{transform_indices = @transform_0, window_bounds = array<i64: 128, 256>}, {pipeline_mode = #tpu.pipeline_mode<synchronous>, transform_indices = @transform_1, window_bounds = array<i64: 256, 64>}, {transform_indices = @transform_2, window_bounds = array<i64: 128, 64>}, {transform_indices = @transform_3, window_bounds = array<i64: 1, 1, 64>}, {transform_indices = @transform_4, window_bounds = array<i64: 1, 1, 64>}]} {
    %c0 = arith.constant 0 : index
    %c0_0 = arith.constant 0 : index
    %0 = vector.load %arg1[%c0, %c0_0] : memref<128x256xbf16, #tpu.memory_space<vmem>>, vector<128x256xbf16>
    %c0_1 = arith.constant 0 : index
    %c0_2 = arith.constant 0 : index
    %1 = vector.load %arg2[%c0_1, %c0_2] : memref<256x64xbf16, #tpu.memory_space<vmem>>, vector<256x64xbf16>
    %cst = arith.constant dense<0.000000e+00> : vector<128x64xf32>
    %2 = tpu.matmul %0, %1, %cst {dimension_numbers = #tpu.dot_dimension_numbers<[1], [0], [0], [1], [0, 0, 1, 1], [], []>} : vector<128x256xbf16>, vector<256x64xbf16>, vector<128x64xf32> -> vector<128x64xf32>
    %3 = arith.truncf %2 : vector<128x64xf32> to vector<128x64xbf16>
    %c0_3 = arith.constant 0 : index
    %c0_4 = arith.constant 0 : index
    %4 = vector.load %arg3[%c0_3, %c0_4] : memref<128x64xbf16, #tpu.memory_space<vmem>>, vector<128x64xbf16>
    tpu.vector_store %arg3[%c0_3, %c0_4], %3 {strides = array<i32>} : memref<128x64xbf16, #tpu.memory_space<vmem>>, vector<128x64xbf16>,
    %cst_5 = arith.constant dense<0.000000e+00> : vector<64xf32>
    %5 = vector.multi_reduction <add>, %2, %cst_5 [0] : vector<128x64xf32> to vector<64xf32>
    %6 = vector.shape_cast %5 : vector<64xf32> to vector<1x1x64xf32>
    %c0_6 = arith.constant 0 : index
    %c0_7 = arith.constant 0 : index
    %c0_8 = arith.constant 0 : index
    %7 = vector.load %arg4[%c0_6, %c0_7, %c0_8] : memref<1x1x64xf32, #tpu.memory_space<vmem>>, vector<1x1x64xf32>
    tpu.vector_store %arg4[%c0_6, %c0_7, %c0_8], %6 {strides = array<i32>} : memref<1x1x64xf32, #tpu.memory_space<vmem>>, vector<1x1x64xf32>,
    %8 = arith.mulf %2, %2 : vector<128x64xf32>
    %cst_9 = arith.constant dense<0.000000e+00> : vector<64xf32>
    %9 = vector.multi_reduction <add>, %8, %cst_9 [0] : vector<128x64xf32> to vector<64xf32>
    %10 = vector.shape_cast %9 : vector<64xf32> to vector<1x1x64xf32>
    %c0_10 = arith.constant 0 : index
    %c0_11 = arith.constant 0 : index
    %c0_12 = arith.constant 0 : index
    %11 = vector.load %arg5[%c0_10, %c0_11, %c0_12] : memref<1x1x64xf32, #tpu.memory_space<vmem>>, vector<1x1x64xf32>
    tpu.vector_store %arg5[%c0_10, %c0_11, %c0_12], %10 {strides = array<i32>} : memref<1x1x64xf32, #tpu.memory_space<vmem>>, vector<1x1x64xf32>,
    return
  }
  func.func @transform_0(%arg0: i32) -> (i32, i32) {
    %c0_i32 = arith.constant 0 : i32
    %c0_i32_0 = arith.constant 0 : i32
    return %arg0, %c0_i32 : i32, i32
  }
  func.func @transform_1(%arg0: i32) -> (i32, i32) {
    %c0_i32 = arith.constant 0 : i32
    %c0_i32_0 = arith.constant 0 : i32
    %c0_i32_1 = arith.constant 0 : i32
    return %c0_i32, %c0_i32_0 : i32, i32
  }
  func.func @transform_2(%arg0: i32) -> (i32, i32) {
    %c0_i32 = arith.constant 0 : i32
    %c0_i32_0 = arith.constant 0 : i32
    return %arg0, %c0_i32 : i32, i32
  }
  func.func @transform_3(%arg0: i32) -> (i32, i32, i32) {
    %c0_i32 = arith.constant 0 : i32
    %c0_i32_0 = arith.constant 0 : i32
    %c0_i32_1 = arith.constant 0 : i32
    return %arg0, %c0_i32, %c0_i32_0 : i32, i32, i32
  }
  func.func @transform_4(%arg0: i32) -> (i32, i32, i32) {
    %c0_i32 = arith.constant 0 : i32
    %c0_i32_0 = arith.constant 0 : i32
    %c0_i32_1 = arith.constant 0 : i32
    return %arg0, %c0_i32, %c0_i32_0 : i32, i32, i32
  }
}

module attributes {stable_mosaic.version = 11 : i64} {
  func.func @_bn_relu_kernel(%arg0: i32, %arg1: memref<64x128xbf16, #tpu.memory_space<vmem>>, %arg2: memref<1x128xf32, #tpu.memory_space<vmem>>, %arg3: memref<1x128xf32, #tpu.memory_space<vmem>>, %arg4: memref<64x128xbf16, #tpu.memory_space<vmem>>) attributes {dimension_semantics = [#tpu.dimension_semantics<parallel>], iteration_bounds = array<i64: 1>, scalar_prefetch = 0 : i64, scratch_operands = 0 : i64, tpu.core_type = #tpu.core_type<tc>, window_params = [{transform_indices = @transform_0, window_bounds = array<i64: 64, 128>}, {pipeline_mode = #tpu.pipeline_mode<synchronous>, transform_indices = @transform_1, window_bounds = array<i64: 1, 128>}, {pipeline_mode = #tpu.pipeline_mode<synchronous>, transform_indices = @transform_2, window_bounds = array<i64: 1, 128>}, {transform_indices = @transform_3, window_bounds = array<i64: 64, 128>}]} {
    %c0 = arith.constant 0 : index
    %c0_0 = arith.constant 0 : index
    %0 = vector.load %arg1[%c0, %c0_0] : memref<64x128xbf16, #tpu.memory_space<vmem>>, vector<64x128xbf16>
    %1 = arith.extf %0 : vector<64x128xbf16> to vector<64x128xf32>
    %c0_1 = arith.constant 0 : index
    %c0_2 = arith.constant 0 : index
    %2 = vector.load %arg2[%c0_1, %c0_2] : memref<1x128xf32, #tpu.memory_space<vmem>>, vector<1x128xf32>
    %3 = vector.broadcast %2 : vector<1x128xf32> to vector<64x128xf32>
    %4 = arith.mulf %1, %3 : vector<64x128xf32>
    %c0_3 = arith.constant 0 : index
    %c0_4 = arith.constant 0 : index
    %5 = vector.load %arg3[%c0_3, %c0_4] : memref<1x128xf32, #tpu.memory_space<vmem>>, vector<1x128xf32>
    %6 = vector.broadcast %5 : vector<1x128xf32> to vector<64x128xf32>
    %7 = arith.addf %4, %6 : vector<64x128xf32>
    %cst = arith.constant 0.000000e+00 : f32
    %8 = vector.broadcast %cst : f32 to vector<64x128xf32>
    %9 = arith.maximumf %7, %8 : vector<64x128xf32>
    %10 = arith.truncf %9 : vector<64x128xf32> to vector<64x128xbf16>
    %c0_5 = arith.constant 0 : index
    %c0_6 = arith.constant 0 : index
    %11 = vector.load %arg4[%c0_5, %c0_6] : memref<64x128xbf16, #tpu.memory_space<vmem>>, vector<64x128xbf16>
    tpu.vector_store %arg4[%c0_5, %c0_6], %10 {strides = array<i32>} : memref<64x128xbf16, #tpu.memory_space<vmem>>, vector<64x128xbf16>,
    return
  }
  func.func @transform_0(%arg0: i32) -> (i32, i32) {
    %c0_i32 = arith.constant 0 : i32
    %c0_i32_0 = arith.constant 0 : i32
    return %arg0, %c0_i32 : i32, i32
  }
  func.func @transform_1(%arg0: i32) -> (i32, i32) {
    %c0_i32 = arith.constant 0 : i32
    %c0_i32_0 = arith.constant 0 : i32
    %c0_i32_1 = arith.constant 0 : i32
    return %c0_i32, %c0_i32_0 : i32, i32
  }
  func.func @transform_2(%arg0: i32) -> (i32, i32) {
    %c0_i32 = arith.constant 0 : i32
    %c0_i32_0 = arith.constant 0 : i32
    %c0_i32_1 = arith.constant 0 : i32
    return %c0_i32, %c0_i32_0 : i32, i32
  }
  func.func @transform_3(%arg0: i32) -> (i32, i32) {
    %c0_i32 = arith.constant 0 : i32
    %c0_i32_0 = arith.constant 0 : i32
    return %arg0, %c0_i32 : i32, i32
  }
}

module attributes {stable_mosaic.version = 11 : i64} {
  func.func @_matmul_stats_kernel(%arg0: i32, %arg1: memref<32x640xbf16, #tpu.memory_space<vmem>>, %arg2: memref<640x64xbf16, #tpu.memory_space<vmem>>, %arg3: memref<32x64xbf16, #tpu.memory_space<vmem>>, %arg4: memref<1x1x64xf32, #tpu.memory_space<vmem>>, %arg5: memref<1x1x64xf32, #tpu.memory_space<vmem>>) attributes {dimension_semantics = [#tpu.dimension_semantics<parallel>], iteration_bounds = array<i64: 1>, scalar_prefetch = 0 : i64, scratch_operands = 0 : i64, tpu.core_type = #tpu.core_type<tc>, window_params = [{transform_indices = @transform_0, window_bounds = array<i64: 32, 640>}, {pipeline_mode = #tpu.pipeline_mode<synchronous>, transform_indices = @transform_1, window_bounds = array<i64: 640, 64>}, {transform_indices = @transform_2, window_bounds = array<i64: 32, 64>}, {transform_indices = @transform_3, window_bounds = array<i64: 1, 1, 64>}, {transform_indices = @transform_4, window_bounds = array<i64: 1, 1, 64>}]} {
    %c0 = arith.constant 0 : index
    %c0_0 = arith.constant 0 : index
    %0 = vector.load %arg1[%c0, %c0_0] : memref<32x640xbf16, #tpu.memory_space<vmem>>, vector<32x640xbf16>
    %c0_1 = arith.constant 0 : index
    %c0_2 = arith.constant 0 : index
    %1 = vector.load %arg2[%c0_1, %c0_2] : memref<640x64xbf16, #tpu.memory_space<vmem>>, vector<640x64xbf16>
    %cst = arith.constant dense<0.000000e+00> : vector<32x64xf32>
    %2 = tpu.matmul %0, %1, %cst {dimension_numbers = #tpu.dot_dimension_numbers<[1], [0], [0], [1], [0, 0, 1, 1], [], []>} : vector<32x640xbf16>, vector<640x64xbf16>, vector<32x64xf32> -> vector<32x64xf32>
    %3 = arith.truncf %2 : vector<32x64xf32> to vector<32x64xbf16>
    %c0_3 = arith.constant 0 : index
    %c0_4 = arith.constant 0 : index
    %4 = vector.load %arg3[%c0_3, %c0_4] : memref<32x64xbf16, #tpu.memory_space<vmem>>, vector<32x64xbf16>
    tpu.vector_store %arg3[%c0_3, %c0_4], %3 {strides = array<i32>} : memref<32x64xbf16, #tpu.memory_space<vmem>>, vector<32x64xbf16>,
    %cst_5 = arith.constant dense<0.000000e+00> : vector<64xf32>
    %5 = vector.multi_reduction <add>, %2, %cst_5 [0] : vector<32x64xf32> to vector<64xf32>
    %6 = vector.shape_cast %5 : vector<64xf32> to vector<1x1x64xf32>
    %c0_6 = arith.constant 0 : index
    %c0_7 = arith.constant 0 : index
    %c0_8 = arith.constant 0 : index
    %7 = vector.load %arg4[%c0_6, %c0_7, %c0_8] : memref<1x1x64xf32, #tpu.memory_space<vmem>>, vector<1x1x64xf32>
    tpu.vector_store %arg4[%c0_6, %c0_7, %c0_8], %6 {strides = array<i32>} : memref<1x1x64xf32, #tpu.memory_space<vmem>>, vector<1x1x64xf32>,
    %8 = arith.mulf %2, %2 : vector<32x64xf32>
    %cst_9 = arith.constant dense<0.000000e+00> : vector<64xf32>
    %9 = vector.multi_reduction <add>, %8, %cst_9 [0] : vector<32x64xf32> to vector<64xf32>
    %10 = vector.shape_cast %9 : vector<64xf32> to vector<1x1x64xf32>
    %c0_10 = arith.constant 0 : index
    %c0_11 = arith.constant 0 : index
    %c0_12 = arith.constant 0 : index
    %11 = vector.load %arg5[%c0_10, %c0_11, %c0_12] : memref<1x1x64xf32, #tpu.memory_space<vmem>>, vector<1x1x64xf32>
    tpu.vector_store %arg5[%c0_10, %c0_11, %c0_12], %10 {strides = array<i32>} : memref<1x1x64xf32, #tpu.memory_space<vmem>>, vector<1x1x64xf32>,
    return
  }
  func.func @transform_0(%arg0: i32) -> (i32, i32) {
    %c0_i32 = arith.constant 0 : i32
    %c0_i32_0 = arith.constant 0 : i32
    return %arg0, %c0_i32 : i32, i32
  }
  func.func @transform_1(%arg0: i32) -> (i32, i32) {
    %c0_i32 = arith.constant 0 : i32
    %c0_i32_0 = arith.constant 0 : i32
    %c0_i32_1 = arith.constant 0 : i32
    return %c0_i32, %c0_i32_0 : i32, i32
  }
  func.func @transform_2(%arg0: i32) -> (i32, i32) {
    %c0_i32 = arith.constant 0 : i32
    %c0_i32_0 = arith.constant 0 : i32
    return %arg0, %c0_i32 : i32, i32
  }
  func.func @transform_3(%arg0: i32) -> (i32, i32, i32) {
    %c0_i32 = arith.constant 0 : i32
    %c0_i32_0 = arith.constant 0 : i32
    %c0_i32_1 = arith.constant 0 : i32
    return %arg0, %c0_i32, %c0_i32_0 : i32, i32, i32
  }
  func.func @transform_4(%arg0: i32) -> (i32, i32, i32) {
    %c0_i32 = arith.constant 0 : i32
    %c0_i32_0 = arith.constant 0 : i32
    %c0_i32_1 = arith.constant 0 : i32
    return %arg0, %c0_i32, %c0_i32_0 : i32, i32, i32
  }
}

module attributes {stable_mosaic.version = 11 : i64} {
  func.func @_bn_relu_kernel(%arg0: i32, %arg1: memref<16x128xbf16, #tpu.memory_space<vmem>>, %arg2: memref<1x128xf32, #tpu.memory_space<vmem>>, %arg3: memref<1x128xf32, #tpu.memory_space<vmem>>, %arg4: memref<16x128xbf16, #tpu.memory_space<vmem>>) attributes {dimension_semantics = [#tpu.dimension_semantics<parallel>], iteration_bounds = array<i64: 1>, scalar_prefetch = 0 : i64, scratch_operands = 0 : i64, tpu.core_type = #tpu.core_type<tc>, window_params = [{transform_indices = @transform_0, window_bounds = array<i64: 16, 128>}, {pipeline_mode = #tpu.pipeline_mode<synchronous>, transform_indices = @transform_1, window_bounds = array<i64: 1, 128>}, {pipeline_mode = #tpu.pipeline_mode<synchronous>, transform_indices = @transform_2, window_bounds = array<i64: 1, 128>}, {transform_indices = @transform_3, window_bounds = array<i64: 16, 128>}]} {
    %c0 = arith.constant 0 : index
    %c0_0 = arith.constant 0 : index
    %0 = vector.load %arg1[%c0, %c0_0] : memref<16x128xbf16, #tpu.memory_space<vmem>>, vector<16x128xbf16>
    %1 = arith.extf %0 : vector<16x128xbf16> to vector<16x128xf32>
    %c0_1 = arith.constant 0 : index
    %c0_2 = arith.constant 0 : index
    %2 = vector.load %arg2[%c0_1, %c0_2] : memref<1x128xf32, #tpu.memory_space<vmem>>, vector<1x128xf32>
    %3 = vector.broadcast %2 : vector<1x128xf32> to vector<16x128xf32>
    %4 = arith.mulf %1, %3 : vector<16x128xf32>
    %c0_3 = arith.constant 0 : index
    %c0_4 = arith.constant 0 : index
    %5 = vector.load %arg3[%c0_3, %c0_4] : memref<1x128xf32, #tpu.memory_space<vmem>>, vector<1x128xf32>
    %6 = vector.broadcast %5 : vector<1x128xf32> to vector<16x128xf32>
    %7 = arith.addf %4, %6 : vector<16x128xf32>
    %cst = arith.constant 0.000000e+00 : f32
    %8 = vector.broadcast %cst : f32 to vector<16x128xf32>
    %9 = arith.maximumf %7, %8 : vector<16x128xf32>
    %10 = arith.truncf %9 : vector<16x128xf32> to vector<16x128xbf16>
    %c0_5 = arith.constant 0 : index
    %c0_6 = arith.constant 0 : index
    %11 = vector.load %arg4[%c0_5, %c0_6] : memref<16x128xbf16, #tpu.memory_space<vmem>>, vector<16x128xbf16>
    tpu.vector_store %arg4[%c0_5, %c0_6], %10 {strides = array<i32>} : memref<16x128xbf16, #tpu.memory_space<vmem>>, vector<16x128xbf16>,
    return
  }
  func.func @transform_0(%arg0: i32) -> (i32, i32) {
    %c0_i32 = arith.constant 0 : i32
    %c0_i32_0 = arith.constant 0 : i32
    return %arg0, %c0_i32 : i32, i32
  }
  func.func @transform_1(%arg0: i32) -> (i32, i32) {
    %c0_i32 = arith.constant 0 : i32
    %c0_i32_0 = arith.constant 0 : i32
    %c0_i32_1 = arith.constant 0 : i32
    return %c0_i32, %c0_i32_0 : i32, i32
  }
  func.func @transform_2(%arg0: i32) -> (i32, i32) {
    %c0_i32 = arith.constant 0 : i32
    %c0_i32_0 = arith.constant 0 : i32
    %c0_i32_1 = arith.constant 0 : i32
    return %c0_i32, %c0_i32_0 : i32, i32
  }
  func.func @transform_3(%arg0: i32) -> (i32, i32) {
    %c0_i32 = arith.constant 0 : i32
    %c0_i32_0 = arith.constant 0 : i32
    return %arg0, %c0_i32 : i32, i32
  }
}

module attributes {stable_mosaic.version = 11 : i64} {
  func.func @_matmul_stats_kernel(%arg0: i32, %arg1: memref<16x640xbf16, #tpu.memory_space<vmem>>, %arg2: memref<640x64xbf16, #tpu.memory_space<vmem>>, %arg3: memref<16x64xbf16, #tpu.memory_space<vmem>>, %arg4: memref<1x1x64xf32, #tpu.memory_space<vmem>>, %arg5: memref<1x1x64xf32, #tpu.memory_space<vmem>>) attributes {dimension_semantics = [#tpu.dimension_semantics<parallel>], iteration_bounds = array<i64: 1>, scalar_prefetch = 0 : i64, scratch_operands = 0 : i64, tpu.core_type = #tpu.core_type<tc>, window_params = [{transform_indices = @transform_0, window_bounds = array<i64: 16, 640>}, {pipeline_mode = #tpu.pipeline_mode<synchronous>, transform_indices = @transform_1, window_bounds = array<i64: 640, 64>}, {transform_indices = @transform_2, window_bounds = array<i64: 16, 64>}, {transform_indices = @transform_3, window_bounds = array<i64: 1, 1, 64>}, {transform_indices = @transform_4, window_bounds = array<i64: 1, 1, 64>}]} {
    %c0 = arith.constant 0 : index
    %c0_0 = arith.constant 0 : index
    %0 = vector.load %arg1[%c0, %c0_0] : memref<16x640xbf16, #tpu.memory_space<vmem>>, vector<16x640xbf16>
    %c0_1 = arith.constant 0 : index
    %c0_2 = arith.constant 0 : index
    %1 = vector.load %arg2[%c0_1, %c0_2] : memref<640x64xbf16, #tpu.memory_space<vmem>>, vector<640x64xbf16>
    %cst = arith.constant dense<0.000000e+00> : vector<16x64xf32>
    %2 = tpu.matmul %0, %1, %cst {dimension_numbers = #tpu.dot_dimension_numbers<[1], [0], [0], [1], [0, 0, 1, 1], [], []>} : vector<16x640xbf16>, vector<640x64xbf16>, vector<16x64xf32> -> vector<16x64xf32>
    %3 = arith.truncf %2 : vector<16x64xf32> to vector<16x64xbf16>
    %c0_3 = arith.constant 0 : index
    %c0_4 = arith.constant 0 : index
    %4 = vector.load %arg3[%c0_3, %c0_4] : memref<16x64xbf16, #tpu.memory_space<vmem>>, vector<16x64xbf16>
    tpu.vector_store %arg3[%c0_3, %c0_4], %3 {strides = array<i32>} : memref<16x64xbf16, #tpu.memory_space<vmem>>, vector<16x64xbf16>,
    %cst_5 = arith.constant dense<0.000000e+00> : vector<64xf32>
    %5 = vector.multi_reduction <add>, %2, %cst_5 [0] : vector<16x64xf32> to vector<64xf32>
    %6 = vector.shape_cast %5 : vector<64xf32> to vector<1x1x64xf32>
    %c0_6 = arith.constant 0 : index
    %c0_7 = arith.constant 0 : index
    %c0_8 = arith.constant 0 : index
    %7 = vector.load %arg4[%c0_6, %c0_7, %c0_8] : memref<1x1x64xf32, #tpu.memory_space<vmem>>, vector<1x1x64xf32>
    tpu.vector_store %arg4[%c0_6, %c0_7, %c0_8], %6 {strides = array<i32>} : memref<1x1x64xf32, #tpu.memory_space<vmem>>, vector<1x1x64xf32>,
    %8 = arith.mulf %2, %2 : vector<16x64xf32>
    %cst_9 = arith.constant dense<0.000000e+00> : vector<64xf32>
    %9 = vector.multi_reduction <add>, %8, %cst_9 [0] : vector<16x64xf32> to vector<64xf32>
    %10 = vector.shape_cast %9 : vector<64xf32> to vector<1x1x64xf32>
    %c0_10 = arith.constant 0 : index
    %c0_11 = arith.constant 0 : index
    %c0_12 = arith.constant 0 : index
    %11 = vector.load %arg5[%c0_10, %c0_11, %c0_12] : memref<1x1x64xf32, #tpu.memory_space<vmem>>, vector<1x1x64xf32>
    tpu.vector_store %arg5[%c0_10, %c0_11, %c0_12], %10 {strides = array<i32>} : memref<1x1x64xf32, #tpu.memory_space<vmem>>, vector<1x1x64xf32>,
    return
  }
  func.func @transform_0(%arg0: i32) -> (i32, i32) {
    %c0_i32 = arith.constant 0 : i32
    %c0_i32_0 = arith.constant 0 : i32
    return %arg0, %c0_i32 : i32, i32
  }
  func.func @transform_1(%arg0: i32) -> (i32, i32) {
    %c0_i32 = arith.constant 0 : i32
    %c0_i32_0 = arith.constant 0 : i32
    %c0_i32_1 = arith.constant 0 : i32
    return %c0_i32, %c0_i32_0 : i32, i32
  }
  func.func @transform_2(%arg0: i32) -> (i32, i32) {
    %c0_i32 = arith.constant 0 : i32
    %c0_i32_0 = arith.constant 0 : i32
    return %arg0, %c0_i32 : i32, i32
  }
  func.func @transform_3(%arg0: i32) -> (i32, i32, i32) {
    %c0_i32 = arith.constant 0 : i32
    %c0_i32_0 = arith.constant 0 : i32
    %c0_i32_1 = arith.constant 0 : i32
    return %arg0, %c0_i32, %c0_i32_0 : i32, i32, i32
  }
  func.func @transform_4(%arg0: i32) -> (i32, i32, i32) {
    %c0_i32 = arith.constant 0 : i32
    %c0_i32_0 = arith.constant 0 : i32
    %c0_i32_1 = arith.constant 0 : i32
    return %arg0, %c0_i32, %c0_i32_0 : i32, i32, i32
  }
}

module attributes {stable_mosaic.version = 11 : i64} {
  func.func @_bn_relu_kernel(%arg0: i32, %arg1: memref<8x128xbf16, #tpu.memory_space<vmem>>, %arg2: memref<1x128xf32, #tpu.memory_space<vmem>>, %arg3: memref<1x128xf32, #tpu.memory_space<vmem>>, %arg4: memref<8x128xbf16, #tpu.memory_space<vmem>>) attributes {dimension_semantics = [#tpu.dimension_semantics<parallel>], iteration_bounds = array<i64: 1>, scalar_prefetch = 0 : i64, scratch_operands = 0 : i64, tpu.core_type = #tpu.core_type<tc>, window_params = [{transform_indices = @transform_0, window_bounds = array<i64: 8, 128>}, {pipeline_mode = #tpu.pipeline_mode<synchronous>, transform_indices = @transform_1, window_bounds = array<i64: 1, 128>}, {pipeline_mode = #tpu.pipeline_mode<synchronous>, transform_indices = @transform_2, window_bounds = array<i64: 1, 128>}, {transform_indices = @transform_3, window_bounds = array<i64: 8, 128>}]} {
    %c0 = arith.constant 0 : index
    %c0_0 = arith.constant 0 : index
    %0 = vector.load %arg1[%c0, %c0_0] : memref<8x128xbf16, #tpu.memory_space<vmem>>, vector<8x128xbf16>
    %1 = arith.extf %0 : vector<8x128xbf16> to vector<8x128xf32>
    %c0_1 = arith.constant 0 : index
    %c0_2 = arith.constant 0 : index
    %2 = vector.load %arg2[%c0_1, %c0_2] : memref<1x128xf32, #tpu.memory_space<vmem>>, vector<1x128xf32>
    %3 = vector.broadcast %2 : vector<1x128xf32> to vector<8x128xf32>
    %4 = arith.mulf %1, %3 : vector<8x128xf32>
    %c0_3 = arith.constant 0 : index
    %c0_4 = arith.constant 0 : index
    %5 = vector.load %arg3[%c0_3, %c0_4] : memref<1x128xf32, #tpu.memory_space<vmem>>, vector<1x128xf32>
    %6 = vector.broadcast %5 : vector<1x128xf32> to vector<8x128xf32>
    %7 = arith.addf %4, %6 : vector<8x128xf32>
    %cst = arith.constant 0.000000e+00 : f32
    %8 = vector.broadcast %cst : f32 to vector<8x128xf32>
    %9 = arith.maximumf %7, %8 : vector<8x128xf32>
    %10 = arith.truncf %9 : vector<8x128xf32> to vector<8x128xbf16>
    %c0_5 = arith.constant 0 : index
    %c0_6 = arith.constant 0 : index
    %11 = vector.load %arg4[%c0_5, %c0_6] : memref<8x128xbf16, #tpu.memory_space<vmem>>, vector<8x128xbf16>
    tpu.vector_store %arg4[%c0_5, %c0_6], %10 {strides = array<i32>} : memref<8x128xbf16, #tpu.memory_space<vmem>>, vector<8x128xbf16>,
    return
  }
  func.func @transform_0(%arg0: i32) -> (i32, i32) {
    %c0_i32 = arith.constant 0 : i32
    %c0_i32_0 = arith.constant 0 : i32
    return %arg0, %c0_i32 : i32, i32
  }
  func.func @transform_1(%arg0: i32) -> (i32, i32) {
    %c0_i32 = arith.constant 0 : i32
    %c0_i32_0 = arith.constant 0 : i32
    %c0_i32_1 = arith.constant 0 : i32
    return %c0_i32, %c0_i32_0 : i32, i32
  }
  func.func @transform_2(%arg0: i32) -> (i32, i32) {
    %c0_i32 = arith.constant 0 : i32
    %c0_i32_0 = arith.constant 0 : i32
    %c0_i32_1 = arith.constant 0 : i32
    return %c0_i32, %c0_i32_0 : i32, i32
  }
  func.func @transform_3(%arg0: i32) -> (i32, i32) {
    %c0_i32 = arith.constant 0 : i32
    %c0_i32_0 = arith.constant 0 : i32
    return %arg0, %c0_i32 : i32, i32
  }
}

module attributes {stable_mosaic.version = 11 : i64} {
  func.func @_matmul_stats_kernel(%arg0: i32, %arg1: memref<16x64xbf16, #tpu.memory_space<vmem>>, %arg2: memref<64x32xbf16, #tpu.memory_space<vmem>>, %arg3: memref<16x32xbf16, #tpu.memory_space<vmem>>, %arg4: memref<1x1x32xf32, #tpu.memory_space<vmem>>, %arg5: memref<1x1x32xf32, #tpu.memory_space<vmem>>) attributes {dimension_semantics = [#tpu.dimension_semantics<parallel>], iteration_bounds = array<i64: 1>, scalar_prefetch = 0 : i64, scratch_operands = 0 : i64, tpu.core_type = #tpu.core_type<tc>, window_params = [{transform_indices = @transform_0, window_bounds = array<i64: 16, 64>}, {pipeline_mode = #tpu.pipeline_mode<synchronous>, transform_indices = @transform_1, window_bounds = array<i64: 64, 32>}, {transform_indices = @transform_2, window_bounds = array<i64: 16, 32>}, {transform_indices = @transform_3, window_bounds = array<i64: 1, 1, 32>}, {transform_indices = @transform_4, window_bounds = array<i64: 1, 1, 32>}]} {
    %c0 = arith.constant 0 : index
    %c0_0 = arith.constant 0 : index
    %0 = vector.load %arg1[%c0, %c0_0] : memref<16x64xbf16, #tpu.memory_space<vmem>>, vector<16x64xbf16>
    %c0_1 = arith.constant 0 : index
    %c0_2 = arith.constant 0 : index
    %1 = vector.load %arg2[%c0_1, %c0_2] : memref<64x32xbf16, #tpu.memory_space<vmem>>, vector<64x32xbf16>
    %cst = arith.constant dense<0.000000e+00> : vector<16x32xf32>
    %2 = tpu.matmul %0, %1, %cst {dimension_numbers = #tpu.dot_dimension_numbers<[1], [0], [0], [1], [0, 0, 1, 1], [], []>} : vector<16x64xbf16>, vector<64x32xbf16>, vector<16x32xf32> -> vector<16x32xf32>
    %3 = arith.truncf %2 : vector<16x32xf32> to vector<16x32xbf16>
    %c0_3 = arith.constant 0 : index
    %c0_4 = arith.constant 0 : index
    %4 = vector.load %arg3[%c0_3, %c0_4] : memref<16x32xbf16, #tpu.memory_space<vmem>>, vector<16x32xbf16>
    tpu.vector_store %arg3[%c0_3, %c0_4], %3 {strides = array<i32>} : memref<16x32xbf16, #tpu.memory_space<vmem>>, vector<16x32xbf16>,
    %cst_5 = arith.constant dense<0.000000e+00> : vector<32xf32>
    %5 = vector.multi_reduction <add>, %2, %cst_5 [0] : vector<16x32xf32> to vector<32xf32>
    %6 = vector.shape_cast %5 : vector<32xf32> to vector<1x1x32xf32>
    %c0_6 = arith.constant 0 : index
    %c0_7 = arith.constant 0 : index
    %c0_8 = arith.constant 0 : index
    %7 = vector.load %arg4[%c0_6, %c0_7, %c0_8] : memref<1x1x32xf32, #tpu.memory_space<vmem>>, vector<1x1x32xf32>
    tpu.vector_store %arg4[%c0_6, %c0_7, %c0_8], %6 {strides = array<i32>} : memref<1x1x32xf32, #tpu.memory_space<vmem>>, vector<1x1x32xf32>,
    %8 = arith.mulf %2, %2 : vector<16x32xf32>
    %cst_9 = arith.constant dense<0.000000e+00> : vector<32xf32>
    %9 = vector.multi_reduction <add>, %8, %cst_9 [0] : vector<16x32xf32> to vector<32xf32>
    %10 = vector.shape_cast %9 : vector<32xf32> to vector<1x1x32xf32>
    %c0_10 = arith.constant 0 : index
    %c0_11 = arith.constant 0 : index
    %c0_12 = arith.constant 0 : index
    %11 = vector.load %arg5[%c0_10, %c0_11, %c0_12] : memref<1x1x32xf32, #tpu.memory_space<vmem>>, vector<1x1x32xf32>
    tpu.vector_store %arg5[%c0_10, %c0_11, %c0_12], %10 {strides = array<i32>} : memref<1x1x32xf32, #tpu.memory_space<vmem>>, vector<1x1x32xf32>,
    return
  }
  func.func @transform_0(%arg0: i32) -> (i32, i32) {
    %c0_i32 = arith.constant 0 : i32
    %c0_i32_0 = arith.constant 0 : i32
    return %arg0, %c0_i32 : i32, i32
  }
  func.func @transform_1(%arg0: i32) -> (i32, i32) {
    %c0_i32 = arith.constant 0 : i32
    %c0_i32_0 = arith.constant 0 : i32
    %c0_i32_1 = arith.constant 0 : i32
    return %c0_i32, %c0_i32_0 : i32, i32
  }
  func.func @transform_2(%arg0: i32) -> (i32, i32) {
    %c0_i32 = arith.constant 0 : i32
    %c0_i32_0 = arith.constant 0 : i32
    return %arg0, %c0_i32 : i32, i32
  }
  func.func @transform_3(%arg0: i32) -> (i32, i32, i32) {
    %c0_i32 = arith.constant 0 : i32
    %c0_i32_0 = arith.constant 0 : i32
    %c0_i32_1 = arith.constant 0 : i32
    return %arg0, %c0_i32, %c0_i32_0 : i32, i32, i32
  }
  func.func @transform_4(%arg0: i32) -> (i32, i32, i32) {
    %c0_i32 = arith.constant 0 : i32
    %c0_i32_0 = arith.constant 0 : i32
    %c0_i32_1 = arith.constant 0 : i32
    return %arg0, %c0_i32, %c0_i32_0 : i32, i32, i32
  }
}

module attributes {stable_mosaic.version = 11 : i64} {
  func.func @_bn_relu_kernel(%arg0: i32, %arg1: memref<4x128xbf16, #tpu.memory_space<vmem>>, %arg2: memref<1x128xf32, #tpu.memory_space<vmem>>, %arg3: memref<1x128xf32, #tpu.memory_space<vmem>>, %arg4: memref<4x128xbf16, #tpu.memory_space<vmem>>) attributes {dimension_semantics = [#tpu.dimension_semantics<parallel>], iteration_bounds = array<i64: 1>, scalar_prefetch = 0 : i64, scratch_operands = 0 : i64, tpu.core_type = #tpu.core_type<tc>, window_params = [{transform_indices = @transform_0, window_bounds = array<i64: 4, 128>}, {pipeline_mode = #tpu.pipeline_mode<synchronous>, transform_indices = @transform_1, window_bounds = array<i64: 1, 128>}, {pipeline_mode = #tpu.pipeline_mode<synchronous>, transform_indices = @transform_2, window_bounds = array<i64: 1, 128>}, {transform_indices = @transform_3, window_bounds = array<i64: 4, 128>}]} {
    %c0 = arith.constant 0 : index
    %c0_0 = arith.constant 0 : index
    %0 = vector.load %arg1[%c0, %c0_0] : memref<4x128xbf16, #tpu.memory_space<vmem>>, vector<4x128xbf16>
    %1 = arith.extf %0 : vector<4x128xbf16> to vector<4x128xf32>
    %c0_1 = arith.constant 0 : index
    %c0_2 = arith.constant 0 : index
    %2 = vector.load %arg2[%c0_1, %c0_2] : memref<1x128xf32, #tpu.memory_space<vmem>>, vector<1x128xf32>
    %3 = vector.broadcast %2 : vector<1x128xf32> to vector<4x128xf32>
    %4 = arith.mulf %1, %3 : vector<4x128xf32>
    %c0_3 = arith.constant 0 : index
    %c0_4 = arith.constant 0 : index
    %5 = vector.load %arg3[%c0_3, %c0_4] : memref<1x128xf32, #tpu.memory_space<vmem>>, vector<1x128xf32>
    %6 = vector.broadcast %5 : vector<1x128xf32> to vector<4x128xf32>
    %7 = arith.addf %4, %6 : vector<4x128xf32>
    %cst = arith.constant 0.000000e+00 : f32
    %8 = vector.broadcast %cst : f32 to vector<4x128xf32>
    %9 = arith.maximumf %7, %8 : vector<4x128xf32>
    %10 = arith.truncf %9 : vector<4x128xf32> to vector<4x128xbf16>
    %c0_5 = arith.constant 0 : index
    %c0_6 = arith.constant 0 : index
    %11 = vector.load %arg4[%c0_5, %c0_6] : memref<4x128xbf16, #tpu.memory_space<vmem>>, vector<4x128xbf16>
    tpu.vector_store %arg4[%c0_5, %c0_6], %10 {strides = array<i32>} : memref<4x128xbf16, #tpu.memory_space<vmem>>, vector<4x128xbf16>,
    return
  }
  func.func @transform_0(%arg0: i32) -> (i32, i32) {
    %c0_i32 = arith.constant 0 : i32
    %c0_i32_0 = arith.constant 0 : i32
    return %arg0, %c0_i32 : i32, i32
  }
  func.func @transform_1(%arg0: i32) -> (i32, i32) {
    %c0_i32 = arith.constant 0 : i32
    %c0_i32_0 = arith.constant 0 : i32
    %c0_i32_1 = arith.constant 0 : i32
    return %c0_i32, %c0_i32_0 : i32, i32
  }
  func.func @transform_2(%arg0: i32) -> (i32, i32) {
    %c0_i32 = arith.constant 0 : i32
    %c0_i32_0 = arith.constant 0 : i32
    %c0_i32_1 = arith.constant 0 : i32
    return %c0_i32, %c0_i32_0 : i32, i32
  }
  func.func @transform_3(%arg0: i32) -> (i32, i32) {
    %c0_i32 = arith.constant 0 : i32
    %c0_i32_0 = arith.constant 0 : i32
    return %arg0, %c0_i32 : i32, i32
  }
}

</mosaic_0001>

<bundles_post_ra>
// kernel: spatial_path.9
= control target key start
LH: loop header
LB: loop body
LE: loop exit
PB: predicated region body
PF: predicated region fallthrough
CT: control target
= control target key end

     0   :  { %s222_s0 = inlined_call_operand.vmem [shape: bf16[64,128], index: 0, kind: input, shape index: {}]   ;;  %s223_s1 = inlined_call_operand.vmem [shape: f32[1,128], index: 1, kind: input, shape index: {}]   ;;  %s224_s2 = inlined_call_operand.vmem [shape: f32[1,128], index: 2, kind: input, shape index: {}]   ;;  %s225_s3 = inlined_call_operand.vmem [shape: bf16[64,128], index: 3, kind: output, shape index: {}]  }
   0x1   :  { %v131_v0 = vld [vmem:[%s222_s0] sm:$0xff]   ;;  %v166_v4 = vld [vmem:[%s222_s0 + $0x8] sm:$0xff]   ;;  %v167_v5 = vld [vmem:[%s222_s0 + $0x10] sm:$0xff]  }
   0x2   :  { %v112_v1 = vld [vmem:[%s223_s1] ss:$0 sm:$0xff]  ;;  %v132_v2 = vunpack.c.l.bf16 %v131_v0  ;;  %v133_v3 = vunpack.c.h.bf16 %v131_v0  ;;  %v168_v6 = vld [vmem:[%s222_s0 + $0x18] sm:$0xff]   ;;  %v136_v8 = vunpack.c.l.bf16 %v166_v4  ;;  %v137_v9 = vunpack.c.h.bf16 %v166_v4 }
   0x3   :  { %v113_v7 = vld [vmem:[%s224_s2] ss:$0 sm:$0xff]  ;;  %v140_v10 = vunpack.c.l.bf16 %v167_v5  ;;  %v141_v11 = vunpack.c.h.bf16 %v167_v5  ;;  %v144_v14 = vunpack.c.l.bf16 %v168_v6  ;;  %v145_v15 = vunpack.c.h.bf16 %v168_v6 }
   0x4   :  { %v37_v12 = vmul.f32 %v132_v2, %v112_v1  ;;  %v38_v13 = vmul.f32 %v133_v3, %v112_v1  ;;  %v39_v16 = vmul.f32 %v136_v8, %v112_v1  ;;  %v40_v17 = vmul.f32 %v137_v9, %v112_v1 }
   0x5   :  { %v41_v18 = vmul.f32 %v140_v10, %v112_v1  ;;  %v42_v19 = vmul.f32 %v141_v11, %v112_v1  ;;  %v43_v22 = vmul.f32 %v144_v14, %v112_v1  ;;  %v44_v23 = vmul.f32 %v145_v15, %v112_v1 }
   0x6   :  { %v52_v20 = vadd.f32 %v113_v7, %v37_v12  ;;  %v53_v21 = vadd.f32 %v113_v7, %v38_v13  ;;  %v54_v24 = vadd.f32 %v113_v7, %v39_v16  ;;  %v55_v25 = vadd.f32 %v113_v7, %v40_v17 }
   0x7   :  { %v56_v26 = vadd.f32 %v113_v7, %v41_v18  ;;  %v57_v27 = vadd.f32 %v113_v7, %v42_v19  ;;  %v58_v30 = vadd.f32 %v113_v7, %v43_v22  ;;  %v59_v31 = vadd.f32 %v113_v7, %v44_v23 }
   0x8   :  { %v60_v28 = vmax.f32 %v52_v20, 0.0  ;;  %v61_v29 = vmax.f32 %v53_v21, 0.0  ;;  %v62_v32 = vmax.f32 %v54_v24, 0.0  ;;  %v63_v33 = vmax.f32 %v55_v25, 0.0 }
   0x9   :  { %v64_v34 = vmax.f32 %v56_v26, 0.0  ;;  %v65_v35 = vmax.f32 %v57_v27, 0.0  ;;  %v66_v37 = vmax.f32 %v58_v30, 0.0  ;;  %v67_v38 = vmax.f32 %v59_v31, 0.0 }
   0xa   :  { %v149_v36 = vpack.c.bf16 %v61_v29, %v60_v28  ;;  %v154_v39 = vpack.c.bf16 %v63_v33, %v62_v32 }
   0xb   :  { %v159_v40 = vpack.c.bf16 %v65_v35, %v64_v34  ;;  %v164_v41 = vpack.c.bf16 %v67_v38, %v66_v37 }
   0xc   :  { %150 = vst [vmem:[%s225_s3] sm:$0xff] %v149_v36   ;;  %169 = vst [vmem:[%s225_s3 + $0x8] sm:$0xff] %v154_v39  }
   0xd   :  { %170 = vst [vmem:[%s225_s3 + $0x10] sm:$0xff] %v159_v40   ;;  %171 = vst [vmem:[%s225_s3 + $0x18] sm:$0xff] %v164_v41  }

// kernel: spatial_path.8
= control target key start
LH: loop header
LB: loop body
LE: loop exit
PB: predicated region body
PF: predicated region fallthrough
CT: control target
= control target key end

     0   :  { %vm400_vm0 = vcmask 519168   ;;  %vm417_vm1 = vcmask 523264   ;;  %vm455_vm2 = vcmask 516096   ;;  %s965_s1 = inlined_call_operand.vmem [shape: bf16[256,64], index: 1, kind: input, shape index: {}]   ;;  %s966_s0 = inlined_call_operand.vmem [shape: bf16[128,256], index: 0, kind: input, shape index: {}]   ;;  %s967_s2 = inlined_call_operand.vmem [shape: bf16[128,64], index: 2, kind: output, shape index: {0}]   ;;  %s968_s3 = inlined_call_operand.vmem [shape: f32[1,1,64], index: 3, kind: output, shape index: {1}]   ;;  %s969_s4 = inlined_call_operand.vmem [shape: f32[1,1,64], index: 4, kind: output, shape index: {2}]  }
   0x1   :  { %v667_v0 = vld [vmem:[%s965_s1 + $0x40] sm:$0xff]   ;;  %v669_v2 = vld [vmem:[%s965_s1 + $0x48] sm:$0xff]   ;;  %v671_v4 = vld [vmem:[%s965_s1 + $0x50] sm:$0xff]  }
   0x2   :  { %v668_v1 = vld [vmem:[%s965_s1] sm:$0xff]   ;;  %587 = vmatprep.subr.bf16.mxu0 %v667_v0  ;;  %651 = vmatprep.subr.bf16.mxu1 %v667_v0  ;;  %v670_v3 = vld [vmem:[%s965_s1 + $0x8] sm:$0xff]   ;;  %v672_v5 = vld [vmem:[%s965_s1 + $0x10] sm:$0xff]  }
   0x3   :  { %588 = vmatpush3.bf16.msra.mxu0 %v668_v1  ;;  %659 = vmatpush3.bf16.msra.mxu1 %v668_v1  ;;  %v673_v6 = vld [vmem:[%s965_s1 + $0x58] sm:$0xff]   ;;  %v675_v8 = vld [vmem:[%s965_s1 + $0x60] sm:$0xff]   ;;  %v677_v10 = vld [vmem:[%s965_s1 + $0x68] sm:$0xff]  }
   0x4   :  { %589 = vmatprep.subr.bf16.mxu0 %v669_v2  ;;  %652 = vmatprep.subr.bf16.mxu1 %v669_v2  ;;  %v674_v7 = vld [vmem:[%s965_s1 + $0x18] sm:$0xff]   ;;  %v676_v9 = vld [vmem:[%s965_s1 + $0x20] sm:$0xff]   ;;  %v678_v12 = vld [vmem:[%s965_s1 + $0x28] sm:$0xff]  }
   0x5   :  { %v685_v11 = vld [vmem:[%s966_s0 + $0x4] ss:$8 sps:$4 sm:$0xff]   ;;  %v679_v14 = vld [vmem:[%s965_s1 + $0x70] sm:$0xff]   ;;  %v681_v16 = vld [vmem:[%s965_s1 + $0x78] sm:$0xff]  }
   0x6   :  { %v691_v13 = vld [vmem:[%s966_s0 + $0x44] ss:$8 sps:$4 sm:$0xff]   ;;  %271 = vmatprep.mubr.bf16.mxu0 %v685_v11  ;;  %v680_v15 = vld [vmem:[%s965_s1 + $0x30] sm:$0xff]   ;;  %v682_v17 = vld [vmem:[%s965_s1 + $0x38] sm:$0xff]  }
   0x7   :  { %590 = vmatpush3.bf16.msra.mxu0 %v670_v3  ;;  %660 = vmatpush3.bf16.msra.mxu1 %v670_v3  ;;  %v683_v18 = vld [vmem:[%s966_s0] ss:$8 sps:$4 sm:$0xff]   ;;  %v686_v20 = vld [vmem:[%s966_s0 + $0x14] ss:$8 sps:$4 sm:$0xff]   ;;  %v688_v22 = vld [vmem:[%s966_s0 + $0x10] ss:$8 sps:$4 sm:$0xff]  }
   0x8   :  { %591 = vmatprep.subr.bf16.mxu0 %v671_v4  ;;  %653 = vmatprep.subr.bf16.mxu1 %v671_v4  ;;  %v689_v19 = vld [vmem:[%s966_s0 + $0x40] ss:$8 sps:$4 sm:$0xff]   ;;  %v695_v21 = vld [vmem:[%s966_s0 + $0x54] ss:$8 sps:$4 sm:$0xff]   ;;  %v697_v23 = vld [vmem:[%s966_s0 + $0x50] ss:$8 sps:$4 sm:$0xff]  }
   0x9   :  { %303 = vmatprep.mubr.bf16.mxu1 %v691_v13  ;;  %v692_v24 = vld [vmem:[%s966_s0 + $0x24] ss:$8 sps:$4 sm:$0xff]   ;;  %v694_v26 = vld [vmem:[%s966_s0 + $0x20] ss:$8 sps:$4 sm:$0xff]   ;;  %v698_v28 = vld [vmem:[%s966_s0 + $0x34] ss:$8 sps:$4 sm:$0xff]  }
   0xa   :  { %v701_v25 = vld [vmem:[%s966_s0 + $0x64] ss:$8 sps:$4 sm:$0xff]   ;;  %v703_v27 = vld [vmem:[%s966_s0 + $0x60] ss:$8 sps:$4 sm:$0xff]   ;;  %v704_v29 = vld [vmem:[%s966_s0 + $0x74] ss:$8 sps:$4 sm:$0xff]  }
   0xb   :  { %592 = vmatpush3.bf16.msra.mxu0 %v672_v5  ;;  %661 = vmatpush3.bf16.msra.mxu1 %v672_v5  ;;  %v700_v30 = vld [vmem:[%s966_s0 + $0x30] ss:$8 sps:$4 sm:$0xff]  }
   0xc   :  { %593 = vmatprep.subr.bf16.mxu0 %v673_v6  ;;  %654 = vmatprep.subr.bf16.mxu1 %v673_v6  ;;  %v706_v31 = vld [vmem:[%s966_s0 + $0x70] ss:$8 sps:$4 sm:$0xff]  }
   0xf   :  { %594 = vmatpush3.bf16.msra.mxu0 %v674_v7  ;;  %662 = vmatpush3.bf16.msra.mxu1 %v674_v7 }
  0x10   :  { %595 = vmatprep.subr.bf16.mxu0 %v675_v8  ;;  %655 = vmatprep.subr.bf16.mxu1 %v675_v8 }
  0x13   :  { %596 = vmatpush3.bf16.msra.mxu0 %v676_v9  ;;  %663 = vmatpush3.bf16.msra.mxu1 %v676_v9 }
  0x14   :  { %597 = vmatprep.subr.bf16.mxu0 %v677_v10  ;;  %656 = vmatprep.subr.bf16.mxu1 %v677_v10 }
  0x17   :  { %598 = vmatpush3.bf16.msra.mxu0 %v678_v12  ;;  %664 = vmatpush3.bf16.msra.mxu1 %v678_v12 }
  0x18   :  { %599 = vmatprep.subr.bf16.mxu0 %v679_v14  ;;  %657 = vmatprep.subr.bf16.mxu1 %v679_v14 }
  0x1b   :  { %600 = vmatpush3.bf16.msra.mxu0 %v680_v15  ;;  %665 = vmatpush3.bf16.msra.mxu1 %v680_v15 }
  0x1c   :  { %601 = vmatprep.subr.bf16.mxu0 %v681_v16  ;;  %658 = vmatprep.subr.bf16.mxu1 %v681_v16 }
  0x1f   :  { %602 = vmatpush3.bf16.msra.mxu0 %v682_v17  ;;  %666 = vmatpush3.bf16.msra.mxu1 %v682_v17 }
  0x22   :  { %272 = vmatmul.mubr.bf16.vlgmr.msra.gmra.mrb[0].mxu0 %v683_v18  ;;  %304 = vmatmul.mubr.bf16.vlgmr.msra.gmra.mrb[0].mxu1 %v689_v19 }
  0x23   :  { %279 = vmatprep.mubr.bf16.mxu0 %v686_v20  ;;  %311 = vmatprep.mubr.bf16.mxu1 %v695_v21 }
  0x2a   :  { %280 = vmatmul.mubr.bf16.gmra.mrb[4].mxu0 %v688_v22  ;;  %312 = vmatmul.mubr.bf16.gmra.mrb[4].mxu1 %v697_v23 }
  0x2b   :  { %287 = vmatprep.mubr.bf16.mxu0 %v692_v24  ;;  %319 = vmatprep.mubr.bf16.mxu1 %v701_v25 }
  0x32   :  { %288 = vmatmul.mubr.bf16.gmra.mrb[8].mxu0 %v694_v26  ;;  %320 = vmatmul.mubr.bf16.gmra.mrb[8].mxu1 %v703_v27 }
  0x33   :  { %295 = vmatprep.mubr.bf16.mxu0 %v698_v28  ;;  %327 = vmatprep.mubr.bf16.mxu1 %v704_v29 }
  0x3a   :  { %296 = vmatmul.mubr.bf16.gmra.mrb[12].mxu0 %v700_v30  ;;  %328 = vmatmul.mubr.bf16.gmra.mrb[12].mxu1 %v706_v31 }
  0xf5   :  { %v603_v32 = vpop.f32.mrb[0].mxu0  ;;  %v627_v33 = vpop.f32.mrb[0].mxu1 }
  0xf6   :  { %v604_v34 = vpop.f32.mrb[1].mxu0  ;;  %v628_v35 = vpop.f32.mrb[1].mxu1 }
  0xf7   :  { %v605_v36 = vadd.f32 %v604_v34, %v603_v32  ;;  %v606_v37 = vpop.f32.mrb[2].mxu0  ;;  %v828_v38 = vadd.f32 %v628_v35, %v627_v33  ;;  %v630_v39 = vpop.f32.mrb[2].mxu1 }
  0xf8   :  { %v607_v40 = vpop.f32.mrb[3].mxu0  ;;  %v631_v41 = vpop.f32.mrb[3].mxu1 }
  0xf9   :  { %v571_v42 = vpack.c.bf16 %v605_v36, %v605_v36  ;;  %v457_v43 = vmul.f32 %v605_v36, %v605_v36  ;;  %v608_v44 = vadd.f32 %v607_v40, %v606_v37  ;;  %v579_v45 = vpack.c.bf16 %v828_v38, %v828_v38 }
  0xfa   :  { %v832_v46 = vadd.f32 %v631_v41, %v630_v39  ;;  %v418_v47 = vsel %vm417_vm1, %v605_v36, 0.0 }
  0xfb   :  { %401 = vst.msk [vmem:[%s967_s2] sm:$0xf] %vm400_vm0, %v571_v42  ;;  %v572_v48 = vpack.c.bf16 %v608_v44, %v608_v44  ;;  %v419_v49 = vsel %vm417_vm1, %v608_v44, 0.0  ;;  %v458_v50 = vmul.f32 %v608_v44, %v608_v44  ;;  %409 = vst.msk [vmem:[%s967_s2 + $0x20] sm:$0xf] %vm400_vm0, %v579_v45  ;;  %v473_v53 = vsel %vm417_vm1, %v457_v43, 0.0 }
  0xfc   :  { %v420_v51 = vadd.f32 %v419_v49, %v418_v47  ;;  %v580_v52 = vpack.c.bf16 %v832_v46, %v832_v46 }
  0xfd   :  { %402 = vst.msk [vmem:[%s967_s2 + $0x4] sm:$0xf] %vm400_vm0, %v572_v48  ;;  %v474_v54 = vsel %vm417_vm1, %v458_v50, 0.0  ;;  %v609_v55 = vpop.f32.mrb[4].mxu0  ;;  %v633_v56 = vpop.f32.mrb[4].mxu1 }
  0xfe   :  { %v475_v57 = vadd.f32 %v474_v54, %v473_v53  ;;  %v610_v58 = vpop.f32.mrb[5].mxu0  ;;  %410 = vst.msk [vmem:[%s967_s2 + $0x24] sm:$0xf] %vm400_vm0, %v580_v52  ;;  %v634_v59 = vpop.f32.mrb[5].mxu1 }
  0xff   :  { %v611_v60 = vadd.f32 %v610_v58, %v609_v55  ;;  %v612_v61 = vpop.f32.mrb[6].mxu0  ;;  %v856_v62 = vadd.f32 %v634_v59, %v633_v56  ;;  %v636_v63 = vpop.f32.mrb[6].mxu1 }
 0x100   :  { %v613_v0 = vpop.f32.mrb[7].mxu0  ;;  %v637_v1 = vpop.f32.mrb[7].mxu1 }
 0x101   :  { %v573_v2 = vpack.c.bf16 %v611_v60, %v611_v60  ;;  %v421_v3 = vsel %vm417_vm1, %v611_v60, 0.0  ;;  %v459_v4 = vmul.f32 %v611_v60, %v611_v60  ;;  %v614_v5 = vadd.f32 %v613_v0, %v612_v61 }
 0x102   :  { %v422_v6 = vadd.f32 %v421_v3, %v420_v51  ;;  %v581_v7 = vpack.c.bf16 %v856_v62, %v856_v62  ;;  %v871_v14 = vadd.f32 %v637_v1, %v636_v63  ;;  %v465_v60 = vmul.f32 %v828_v38, %v828_v38 }
 0x103   :  { %403 = vst.msk [vmem:[%s967_s2 + $0x8] sm:$0xf] %vm400_vm0, %v573_v2  ;;  %v476_v8 = vsel %vm417_vm1, %v459_v4, 0.0  ;;  %v574_v9 = vpack.c.bf16 %v614_v5, %v614_v5  ;;  %v423_v10 = vsel %vm417_vm1, %v614_v5, 0.0  ;;  %v460_v11 = vmul.f32 %v614_v5, %v614_v5 }
 0x104   :  { %v477_v12 = vadd.f32 %v476_v8, %v475_v57  ;;  %v424_v13 = vadd.f32 %v423_v10, %v422_v6  ;;  %411 = vst.msk [vmem:[%s967_s2 + $0x28] sm:$0xf] %vm400_vm0, %v581_v7  ;;  %v582_v20 = vpack.c.bf16 %v871_v14, %v871_v14  ;;  %v433_v7 = vsel %vm417_vm1, %v828_v38, 0.0 }
 0x105   :  { %404 = vst.msk [vmem:[%s967_s2 + $0xc] sm:$0xf] %vm400_vm0, %v574_v9  ;;  %v478_v15 = vsel %vm417_vm1, %v460_v11, 0.0  ;;  %v615_v16 = vpop.f32.mrb[8].mxu0  ;;  %v639_v17 = vpop.f32.mrb[8].mxu1  ;;  %v466_v8 = vmul.f32 %v832_v46, %v832_v46  ;;  %v467_v38 = vmul.f32 %v856_v62, %v856_v62 }
 0x106   :  { %v479_v18 = vadd.f32 %v478_v15, %v477_v12  ;;  %v616_v19 = vpop.f32.mrb[9].mxu0  ;;  %v640_v21 = vpop.f32.mrb[9].mxu1  ;;  %412 = vst.msk [vmem:[%s967_s2 + $0x2c] sm:$0xf] %vm400_vm0, %v582_v20  ;;  %v435_v15 = vsel %vm417_vm1, %v832_v46, 0.0  ;;  %v468_v20 = vmul.f32 %v871_v14, %v871_v14 }
 0x107   :  { %v617_v22 = vadd.f32 %v616_v19, %v615_v16  ;;  %v618_v23 = vpop.f32.mrb[10].mxu0  ;;  %v880_v24 = vadd.f32 %v640_v21, %v639_v17  ;;  %v642_v25 = vpop.f32.mrb[10].mxu1  ;;  %v437_v19 = vsel %vm417_vm1, %v856_v62, 0.0 }
 0x108   :  { %v619_v26 = vpop.f32.mrb[11].mxu0  ;;  %v643_v27 = vpop.f32.mrb[11].mxu1 }
 0x109   :  { %v575_v28 = vpack.c.bf16 %v617_v22, %v617_v22  ;;  %v425_v29 = vsel %vm417_vm1, %v617_v22, 0.0  ;;  %v461_v30 = vmul.f32 %v617_v22, %v617_v22  ;;  %v620_v31 = vadd.f32 %v619_v26, %v618_v23 }
 0x10a   :  { %v426_v32 = vadd.f32 %v425_v29, %v424_v13  ;;  %v583_v33 = vpack.c.bf16 %v880_v24, %v880_v24  ;;  %v644_v41 = vadd.f32 %v643_v27, %v642_v25  ;;  %v488_v13 = vsel %vm417_vm1, %v465_v60, 0.0 }
 0x10b   :  { %405 = vst.msk [vmem:[%s967_s2 + $0x10] sm:$0xf] %vm400_vm0, %v575_v28  ;;  %v480_v34 = vsel %vm417_vm1, %v461_v30, 0.0  ;;  %v576_v35 = vpack.c.bf16 %v620_v31, %v620_v31  ;;  %v427_v36 = vsel %vm417_vm1, %v620_v31, 0.0  ;;  %v462_v37 = vmul.f32 %v620_v31, %v620_v31 }
 0x10c   :  { %v481_v39 = vadd.f32 %v480_v34, %v479_v18  ;;  %v428_v40 = vadd.f32 %v427_v36, %v426_v32  ;;  %413 = vst.msk [vmem:[%s967_s2 + $0x30] sm:$0xf] %vm400_vm0, %v583_v33  ;;  %v584_v48 = vpack.c.bf16 %v644_v41, %v644_v41  ;;  %v490_v18 = vsel %vm417_vm1, %v466_v8, 0.0 }
 0x10d   :  { %406 = vst.msk [vmem:[%s967_s2 + $0x14] sm:$0xf] %vm400_vm0, %v576_v35  ;;  %v482_v42 = vsel %vm417_vm1, %v462_v37, 0.0  ;;  %v621_v43 = vpop.f32.mrb[12].mxu0  ;;  %v645_v44 = vpop.f32.mrb[12].mxu1  ;;  %v492_v22 = vsel %vm417_vm1, %v467_v38, 0.0  ;;  %v469_v25 = vmul.f32 %v880_v24, %v880_v24  ;;  %v470_v29 = vmul.f32 %v644_v41, %v644_v41 }
 0x10e   :  { %v483_v45 = vadd.f32 %v482_v42, %v481_v39  ;;  %v622_v47 = vpop.f32.mrb[13].mxu0  ;;  %v646_v49 = vpop.f32.mrb[13].mxu1  ;;  %414 = vst.msk [vmem:[%s967_s2 + $0x34] sm:$0xf] %vm400_vm0, %v584_v48  ;;  %v439_v23 = vsel %vm417_vm1, %v871_v14, 0.0  ;;  %v494_v28 = vsel %vm417_vm1, %v468_v20, 0.0 }
 0x10f   :  { %v623_v50 = vadd.f32 %v622_v47, %v621_v43  ;;  %v624_v51 = vpop.f32.mrb[14].mxu0  ;;  %v647_v52 = vadd.f32 %v646_v49, %v645_v44  ;;  %v648_v53 = vpop.f32.mrb[14].mxu1  ;;  %v441_v62 = vsel %vm417_vm1, %v880_v24, 0.0  ;;  %v496_v33 = vsel %vm417_vm1, %v469_v25, 0.0 }
 0x110   :  { %v625_v54 = vpop.f32.mrb[15].mxu0  ;;  %v649_v55 = vpop.f32.mrb[15].mxu1  ;;  %v443_v34 = vsel %vm417_vm1, %v644_v41, 0.0  ;;  %v498_v37 = vsel %vm417_vm1, %v470_v29, 0.0 }
 0x111   :  { %v577_v56 = vpack.c.bf16 %v623_v50, %v623_v50  ;;  %v429_v57 = vsel %vm417_vm1, %v623_v50, 0.0  ;;  %v463_v58 = vmul.f32 %v623_v50, %v623_v50  ;;  %v626_v59 = vadd.f32 %v625_v54, %v624_v51 }
 0x112   :  { %v430_v61 = vadd.f32 %v429_v57, %v428_v40  ;;  %v585_v63 = vpack.c.bf16 %v647_v52, %v647_v52  ;;  %v650_v6 = vadd.f32 %v649_v55, %v648_v53  ;;  %v471_v30 = vmul.f32 %v647_v52, %v647_v52 }
 0x113   :  { %407 = vst.msk [vmem:[%s967_s2 + $0x18] sm:$0xf] %vm400_vm0, %v577_v56  ;;  %v484_v0 = vsel %vm417_vm1, %v463_v58, 0.0  ;;  %v578_v1 = vpack.c.bf16 %v626_v59, %v626_v59  ;;  %v431_v2 = vsel %vm417_vm1, %v626_v59, 0.0  ;;  %v464_v3 = vmul.f32 %v626_v59, %v626_v59 }
 0x114   :  { %v485_v4 = vadd.f32 %v484_v0, %v483_v45  ;;  %v432_v5 = vadd.f32 %v431_v2, %v430_v61  ;;  %415 = vst.msk [vmem:[%s967_s2 + $0x38] sm:$0xf] %vm400_vm0, %v585_v63  ;;  %v586_v12 = vpack.c.bf16 %v650_v6, %v650_v6  ;;  %v445_v14 = vsel %vm417_vm1, %v647_v52, 0.0 }
 0x115   :  { %408 = vst.msk [vmem:[%s967_s2 + $0x1c] sm:$0xf] %vm400_vm0, %v578_v1  ;;  %v486_v9 = vsel %vm417_vm1, %v464_v3, 0.0  ;;  %v500_v39 = vsel %vm417_vm1, %v471_v30, 0.0  ;;  %v472_v40 = vmul.f32 %v650_v6, %v650_v6  ;;  %v447_v24 = vsel %vm417_vm1, %v650_v6, 0.0 }
 0x116   :  { %v434_v10 = vadd.f32 %v433_v7, %v432_v5  ;;  %v487_v11 = vadd.f32 %v486_v9, %v485_v4  ;;  %416 = vst.msk [vmem:[%s967_s2 + $0x3c] sm:$0xf] %vm400_vm0, %v586_v12 }
 0x117   :  { %v502_v47 = vsel %vm417_vm1, %v472_v40, 0.0 }
 0x118   :  { %v436_v16 = vadd.f32 %v435_v15, %v434_v10  ;;  %v489_v17 = vadd.f32 %v488_v13, %v487_v11 }
 0x11a   :  { %v491_v21 = vadd.f32 %v490_v18, %v489_v17  ;;  %v438_v46 = vadd.f32 %v437_v19, %v436_v16 }
 0x11c   :  { %v440_v26 = vadd.f32 %v439_v23, %v438_v46  ;;  %v493_v27 = vadd.f32 %v492_v22, %v491_v21 }
 0x11e   :  { %v442_v31 = vadd.f32 %v441_v62, %v440_v26  ;;  %v495_v32 = vadd.f32 %v494_v28, %v493_v27 }
 0x120   :  { %v497_v35 = vadd.f32 %v496_v33, %v495_v32  ;;  %v444_v36 = vadd.f32 %v443_v34, %v442_v31 }
 0x122   :  { %v499_v42 = vadd.f32 %v498_v37, %v497_v35  ;;  %v446_v43 = vadd.f32 %v445_v14, %v444_v36 }
 0x124   :  { %v501_v44 = vadd.f32 %v500_v39, %v499_v42  ;;  %v448_v45 = vadd.f32 %v447_v24, %v446_v43 }
 0x126   :  { %v449_v48 = vrot.slane %v448_v45, 4  ;;  %v503_v49 = vadd.f32 %v502_v47, %v501_v44 }
 0x128   :  { %v450_v41 = vadd.f32 %v449_v48, %v448_v45  ;;  %v504_v50 = vrot.slane %v503_v49, 4 }
 0x12a   :  { %v451_v51 = vrot.slane %v450_v41, 2  ;;  %v505_v52 = vadd.f32 %v504_v50, %v503_v49 }
 0x12c   :  { %v452_v53 = vadd.f32 %v451_v51, %v450_v41  ;;  %v506_v54 = vrot.slane %v505_v52, 2 }
 0x12e   :  { %v453_v55 = vrot.slane %v452_v53, 1  ;;  %v507_v56 = vadd.f32 %v506_v54, %v505_v52 }
 0x130   :  { %v454_v57 = vadd.f32 %v453_v55, %v452_v53  ;;  %v508_v58 = vrot.slane %v507_v56, 1 }
 0x132   :  { %456 = vst.msk [vmem:[%s968_s3] sm:$0x1] %vm455_vm2, %v454_v57  ;;  %v509_v59 = vadd.f32 %v508_v58, %v507_v56 }
 0x134   :  { %510 = vst.msk [vmem:[%s969_s4] sm:$0x1] %vm455_vm2, %v509_v59 }

// kernel: spatial_path.11
= control target key start
LH: loop header
LB: loop body
LE: loop exit
PB: predicated region body
PF: predicated region fallthrough
CT: control target
= control target key end

     0   :  { %s99_s0 = inlined_call_operand.vmem [shape: bf16[16,128], index: 0, kind: input, shape index: {}]   ;;  %s100_s1 = inlined_call_operand.vmem [shape: f32[1,128], index: 1, kind: input, shape index: {}]   ;;  %s101_s2 = inlined_call_operand.vmem [shape: f32[1,128], index: 2, kind: input, shape index: {}]   ;;  %s102_s3 = inlined_call_operand.vmem [shape: bf16[16,128], index: 3, kind: output, shape index: {}]  }
   0x1   :  { %v59_v0 = vld [vmem:[%s99_s0] sm:$0xff]  }
   0x2   :  { %v52_v1 = vld [vmem:[%s100_s1] ss:$0 sm:$0xff]  ;;  %v60_v2 = vunpack.c.l.bf16 %v59_v0  ;;  %v61_v3 = vunpack.c.h.bf16 %v59_v0 }
   0x3   :  { %v53_v4 = vld [vmem:[%s101_s2] ss:$0 sm:$0xff] }
   0x4   :  { %v25_v5 = vmul.f32 %v60_v2, %v52_v1  ;;  %v26_v6 = vmul.f32 %v61_v3, %v52_v1 }
   0x6   :  { %v34_v7 = vadd.f32 %v53_v4, %v25_v5  ;;  %v35_v8 = vadd.f32 %v53_v4, %v26_v6 }
   0x8   :  { %v36_v9 = vmax.f32 %v34_v7, 0.0  ;;  %v37_v10 = vmax.f32 %v35_v8, 0.0 }
   0xa   :  { %v65_v11 = vpack.c.bf16 %v37_v10, %v36_v9 }
   0xc   :  { %66 = vst [vmem:[%s102_s3] sm:$0xff] %v65_v11  }

// kernel: spatial_path.10
= control target key start
LH: loop header
LB: loop body
LE: loop exit
PB: predicated region body
PF: predicated region fallthrough
CT: control target
= control target key end

     0   :  { %vm562_vm0 = vcmask 519168   ;;  %vm567_vm1 = vcmask 523264   ;;  %vm581_vm2 = vcmask 516096   ;;  %s1016_s1 = inlined_call_operand.vmem [shape: bf16[640,64], index: 1, kind: input, shape index: {}]   ;;  %s1017_s0 = inlined_call_operand.vmem [shape: bf16[32,640], index: 0, kind: input, shape index: {}]   ;;  %s1018_s2 = inlined_call_operand.vmem [shape: bf16[32,64], index: 2, kind: output, shape index: {0}]   ;;  %s1019_s3 = inlined_call_operand.vmem [shape: f32[1,1,64], index: 3, kind: output, shape index: {1}]   ;;  %s1020_s4 = inlined_call_operand.vmem [shape: f32[1,1,64], index: 4, kind: output, shape index: {2}]  }
   0x1   :  { %v757_v0 = vld [vmem:[%s1016_s1 + $0x40] sm:$0xff]   ;;  %v761_v4 = vld [vmem:[%s1016_s1 + $0x48] sm:$0xff]   ;;  %v765_v8 = vld [vmem:[%s1016_s1 + $0x50] sm:$0xff]  }
   0x2   :  { %v758_v1 = vld [vmem:[%s1016_s1 + $0xc0] sm:$0xff]   ;;  %671 = vmatprep.subr.bf16.mxu0 %v757_v0  ;;  %v762_v5 = vld [vmem:[%s1016_s1 + $0xc8] sm:$0xff]   ;;  %v766_v9 = vld [vmem:[%s1016_s1 + $0xd0] sm:$0xff]  }
   0x3   :  { %v759_v2 = vld [vmem:[%s1016_s1] sm:$0xff]   ;;  %699 = vmatprep.subr.bf16.mxu1 %v758_v1  ;;  %v763_v6 = vld [vmem:[%s1016_s1 + $0x8] sm:$0xff]   ;;  %v767_v10 = vld [vmem:[%s1016_s1 + $0x10] sm:$0xff]  }
   0x4   :  { %v760_v3 = vld [vmem:[%s1016_s1 + $0x80] sm:$0xff]   ;;  %672 = vmatpush3.bf16.msra.mxu0 %v759_v2  ;;  %v764_v7 = vld [vmem:[%s1016_s1 + $0x88] sm:$0xff]   ;;  %v768_v11 = vld [vmem:[%s1016_s1 + $0x90] sm:$0xff]  }
   0x5   :  { %700 = vmatpush3.bf16.msra.mxu1 %v760_v3  ;;  %673 = vmatprep.subr.bf16.mxu0 %v761_v4  ;;  %v769_v12 = vld [vmem:[%s1016_s1 + $0x58] sm:$0xff]   ;;  %v773_v16 = vld [vmem:[%s1016_s1 + $0x60] sm:$0xff]   ;;  %v777_v20 = vld [vmem:[%s1016_s1 + $0x68] sm:$0xff]  }
   0x6   :  { %701 = vmatprep.subr.bf16.mxu1 %v762_v5  ;;  %v770_v13 = vld [vmem:[%s1016_s1 + $0xd8] sm:$0xff]   ;;  %v774_v17 = vld [vmem:[%s1016_s1 + $0xe0] sm:$0xff]   ;;  %v778_v21 = vld [vmem:[%s1016_s1 + $0xe8] sm:$0xff]  }
   0x7   :  { %v771_v14 = vld [vmem:[%s1016_s1 + $0x18] sm:$0xff]   ;;  %v775_v18 = vld [vmem:[%s1016_s1 + $0x20] sm:$0xff]   ;;  %v779_v22 = vld [vmem:[%s1016_s1 + $0x28] sm:$0xff]  }
   0x8   :  { %674 = vmatpush3.bf16.msra.mxu0 %v763_v6  ;;  %v772_v15 = vld [vmem:[%s1016_s1 + $0x98] sm:$0xff]   ;;  %v776_v19 = vld [vmem:[%s1016_s1 + $0xa0] sm:$0xff]   ;;  %v780_v23 = vld [vmem:[%s1016_s1 + $0xa8] sm:$0xff]  }
   0x9   :  { %702 = vmatpush3.bf16.msra.mxu1 %v764_v7  ;;  %675 = vmatprep.subr.bf16.mxu0 %v765_v8  ;;  %v781_v24 = vld [vmem:[%s1016_s1 + $0x70] sm:$0xff]   ;;  %v785_v28 = vld [vmem:[%s1016_s1 + $0x78] sm:$0xff]   ;;  %v794_v35 = vld [vmem:[%s1017_s0 + $0xc] ss:$20 sps:$4 sm:$0xff]  }
   0xa   :  { %703 = vmatprep.subr.bf16.mxu1 %v766_v9  ;;  %v782_v25 = vld [vmem:[%s1016_s1 + $0xf0] sm:$0xff]   ;;  %v786_v29 = vld [vmem:[%s1016_s1 + $0xf8] sm:$0xff]   ;;  %v795_v36 = vld [vmem:[%s1016_s1 + $0x100] sm:$0xff]   ;;  %480 = vmatprep.mubr.bf16.mxu1 %v794_v35 }
   0xb   :  { %v783_v26 = vld [vmem:[%s1016_s1 + $0x30] sm:$0xff]   ;;  %v787_v30 = vld [vmem:[%s1016_s1 + $0x38] sm:$0xff]   ;;  %v796_v37 = vld [vmem:[%s1016_s1 + $0x108] sm:$0xff]  }
   0xc   :  { %676 = vmatpush3.bf16.msra.mxu0 %v767_v10  ;;  %v784_v27 = vld [vmem:[%s1016_s1 + $0xb0] sm:$0xff]   ;;  %v788_v31 = vld [vmem:[%s1016_s1 + $0xb8] sm:$0xff]   ;;  %v800_v39 = vld [vmem:[%s1017_s0 + $0x2c] ss:$20 sps:$4 sm:$0xff]  }
   0xd   :  { %704 = vmatpush3.bf16.msra.mxu1 %v768_v11  ;;  %677 = vmatprep.subr.bf16.mxu0 %v769_v12  ;;  %v789_v32 = vld [vmem:[%s1017_s0] ss:$20 sps:$4 sm:$0xff]   ;;  %v791_v33 = vld [vmem:[%s1017_s0 + $0x4] ss:$20 sps:$4 sm:$0xff]   ;;  %v792_v34 = vld [vmem:[%s1017_s0 + $0x8] ss:$20 sps:$4 sm:$0xff]  }
   0xe   :  { %705 = vmatprep.subr.bf16.mxu1 %v770_v13  ;;  %431 = vmatprep.mubr.bf16.mxu0 %v791_v33  ;;  %v797_v38 = vld [vmem:[%s1016_s1 + $0x110] sm:$0xff]   ;;  %v798_v41 = vld [vmem:[%s1016_s1 + $0x118] sm:$0xff]   ;;  %v799_v45 = vld [vmem:[%s1016_s1 + $0x120] sm:$0xff]  }
   0xf   :  { %v802_v40 = vld [vmem:[%s1017_s0 + $0x34] ss:$20 sps:$4 sm:$0xff]   ;;  %v806_v43 = vld [vmem:[%s1017_s0 + $0x30] ss:$20 sps:$4 sm:$0xff]   ;;  %v808_v48 = vld [vmem:[%s1016_s1 + $0x138] sm:$0xff]  }
  0x10   :  { %678 = vmatpush3.bf16.msra.mxu0 %v771_v14  ;;  %v805_v42 = vld [vmem:[%s1017_s0 + $0x28] ss:$20 sps:$4 sm:$0xff]   ;;  %v809_v44 = vld [vmem:[%s1017_s0 + $0x10] ss:$20 sps:$4 sm:$0xff]   ;;  %v810_v49 = vld [vmem:[%s1017_s0 + $0x38] ss:$20 sps:$4 sm:$0xff]  }
  0x11   :  { %706 = vmatpush3.bf16.msra.mxu1 %v772_v15  ;;  %679 = vmatprep.subr.bf16.mxu0 %v773_v16  ;;  %v804_v46 = vld [vmem:[%s1016_s1 + $0x128] sm:$0xff]   ;;  %v807_v47 = vld [vmem:[%s1016_s1 + $0x130] sm:$0xff]  }
  0x12   :  { %707 = vmatprep.subr.bf16.mxu1 %v774_v17 }
  0x14   :  { %680 = vmatpush3.bf16.msra.mxu0 %v775_v18 }
  0x15   :  { %708 = vmatpush3.bf16.msra.mxu1 %v776_v19  ;;  %681 = vmatprep.subr.bf16.mxu0 %v777_v20 }
  0x16   :  { %709 = vmatprep.subr.bf16.mxu1 %v778_v21 }
  0x18   :  { %682 = vmatpush3.bf16.msra.mxu0 %v779_v22 }
  0x19   :  { %710 = vmatpush3.bf16.msra.mxu1 %v780_v23  ;;  %683 = vmatprep.subr.bf16.mxu0 %v781_v24 }
  0x1a   :  { %711 = vmatprep.subr.bf16.mxu1 %v782_v25 }
  0x1c   :  { %684 = vmatpush3.bf16.msra.mxu0 %v783_v26 }
  0x1d   :  { %712 = vmatpush3.bf16.msra.mxu1 %v784_v27  ;;  %685 = vmatprep.subr.bf16.mxu0 %v785_v28 }
  0x1e   :  { %713 = vmatprep.subr.bf16.mxu1 %v786_v29 }
  0x20   :  { %686 = vmatpush3.bf16.msra.mxu0 %v787_v30 }
  0x21   :  { %714 = vmatpush3.bf16.msra.mxu1 %v788_v31  ;;  %737 = vmatprep.subr.bf16.mxu0 %v795_v36 }
  0x23   :  { %432 = vmatmul.mubr.bf16.vlgmr.msra.gmra.mrb[0].mxu0 %v789_v32 }
  0x24   :  { %481 = vmatmul.mubr.bf16.vlgmr.msra.gmra.mrb[0].mxu1 %v792_v34  ;;  %738 = vmatpush3.bf16.msra.mxu0 %v795_v36 }
  0x25   :  { %739 = vmatprep.subr.bf16.mxu0 %v796_v37  ;;  %439 = vmatprep.mubr.bf16.mxu0 %v800_v39 }
  0x26   :  { %488 = vmatprep.mubr.bf16.mxu1 %v802_v40 }
  0x28   :  { %740 = vmatpush3.bf16.msra.mxu0 %v796_v37 }
  0x29   :  { %741 = vmatprep.subr.bf16.mxu0 %v797_v38 }
  0x2b   :  { %440 = vmatmul.mubr.bf16.gmra.mrb[4].mxu0 %v805_v42 }
  0x2c   :  { %489 = vmatmul.mubr.bf16.gmra.mrb[4].mxu1 %v806_v43  ;;  %742 = vmatpush3.bf16.msra.mxu0 %v797_v38 }
  0x2d   :  { %743 = vmatprep.subr.bf16.mxu0 %v798_v41  ;;  %753 = vmatprep.mubr.bf16.mxu0 %v809_v44 }
  0x30   :  { %744 = vmatpush3.bf16.msra.mxu0 %v798_v41 }
  0x31   :  { %745 = vmatprep.subr.bf16.mxu0 %v799_v45 }
  0x34   :  { %746 = vmatpush3.bf16.msra.mxu0 %v799_v45 }
  0x35   :  { %747 = vmatprep.subr.bf16.mxu0 %v804_v46 }
  0x38   :  { %748 = vmatpush3.bf16.msra.mxu0 %v804_v46 }
  0x39   :  { %749 = vmatprep.subr.bf16.mxu0 %v807_v47 }
  0x3c   :  { %750 = vmatpush3.bf16.msra.mxu0 %v807_v47 }
  0x3d   :  { %751 = vmatprep.subr.bf16.mxu0 %v808_v48 }
  0x40   :  { %752 = vmatpush3.bf16.msra.mxu0 %v808_v48 }
  0x43   :  { %754 = vmatmul.mubr.bf16.vlgmr.msra.gmra.mrb[8].mxu0 %v810_v49 }
  0xf6   :  { %v687_v50 = vpop.f32.mrb[0].mxu0 }
  0xf7   :  { %v715_v51 = vpop.f32.mrb[0].mxu1  ;;  %v688_v52 = vpop.f32.mrb[1].mxu0 }
  0xf8   :  { %v689_v53 = vadd.f32 %v688_v52, %v687_v50  ;;  %v716_v54 = vpop.f32.mrb[1].mxu1  ;;  %v690_v55 = vpop.f32.mrb[2].mxu0 }
  0xf9   :  { %v717_v56 = vadd.f32 %v716_v54, %v715_v51  ;;  %v718_v57 = vpop.f32.mrb[2].mxu1  ;;  %v691_v58 = vpop.f32.mrb[3].mxu0 }
  0xfa   :  { %v692_v59 = vadd.f32 %v691_v58, %v690_v55  ;;  %v719_v60 = vpop.f32.mrb[3].mxu1 }
  0xfb   :  { %v720_v61 = vadd.f32 %v719_v60, %v718_v57  ;;  %v483_v62 = vadd.f32 %v717_v56, %v689_v53 }
  0xfd   :  { %v486_v63 = vadd.f32 %v720_v61, %v692_v59 }
  0xfe   :  { %v693_v0 = vpop.f32.mrb[4].mxu0 }
  0xff   :  { %v721_v1 = vpop.f32.mrb[4].mxu1  ;;  %v694_v2 = vpop.f32.mrb[5].mxu0 }
 0x100   :  { %v695_v3 = vadd.f32 %v694_v2, %v693_v0  ;;  %v722_v4 = vpop.f32.mrb[5].mxu1  ;;  %v696_v5 = vpop.f32.mrb[6].mxu0 }
 0x101   :  { %v723_v6 = vadd.f32 %v722_v4, %v721_v1  ;;  %v724_v7 = vpop.f32.mrb[6].mxu1  ;;  %v697_v8 = vpop.f32.mrb[7].mxu0 }
 0x102   :  { %v698_v9 = vadd.f32 %v697_v8, %v696_v5  ;;  %v725_v10 = vpop.f32.mrb[7].mxu1 }
 0x103   :  { %v726_v11 = vadd.f32 %v725_v10, %v724_v7  ;;  %v491_v12 = vadd.f32 %v723_v6, %v695_v3 }
 0x105   :  { %v494_v13 = vadd.f32 %v726_v11, %v698_v9 }
 0x116   :  { %v755_v14 = vpop.f32.mrb[8].mxu0 }
 0x117   :  { %v540_v15 = vadd.f32 %v755_v14, %v491_v12  ;;  %v531_v16 = vpop.f32.mrb[9].mxu0 }
 0x118   :  { %v532_v17 = vadd.f32 %v531_v16, %v483_v62  ;;  %v756_v18 = vpop.f32.mrb[10].mxu0 }
 0x119   :  { %v669_v19 = vpack.c.bf16 %v540_v15, %v540_v15  ;;  %v543_v20 = vadd.f32 %v756_v18, %v494_v13  ;;  %v534_v21 = vpop.f32.mrb[11].mxu0  ;;  %v585_v25 = vmul.f32 %v540_v15, %v540_v15  ;;  %v571_v32 = vsel %vm567_vm1, %v540_v15, 0.0 }
 0x11a   :  { %v667_v22 = vpack.c.bf16 %v532_v17, %v532_v17  ;;  %v583_v23 = vmul.f32 %v532_v17, %v532_v17  ;;  %v535_v24 = vadd.f32 %v534_v21, %v486_v63  ;;  %v568_v27 = vsel %vm567_vm1, %v532_v17, 0.0 }
 0x11b   :  { %565 = vst.msk [vmem:[%s1018_s2 + $0x8] sm:$0xf] %vm562_vm0, %v669_v19  ;;  %v670_v26 = vpack.c.bf16 %v543_v20, %v543_v20  ;;  %v586_v34 = vmul.f32 %v543_v20, %v543_v20  ;;  %v590_v38 = vsel %vm567_vm1, %v585_v25, 0.0  ;;  %v573_v39 = vsel %vm567_vm1, %v543_v20, 0.0 }
 0x11c   :  { %563 = vst.msk [vmem:[%s1018_s2] sm:$0xf] %vm562_vm0, %v667_v22  ;;  %v668_v28 = vpack.c.bf16 %v535_v24, %v535_v24  ;;  %v569_v29 = vsel %vm567_vm1, %v535_v24, 0.0  ;;  %v584_v30 = vmul.f32 %v535_v24, %v535_v24  ;;  %v587_v33 = vsel %vm567_vm1, %v583_v23, 0.0 }
 0x11d   :  { %566 = vst.msk [vmem:[%s1018_s2 + $0xc] sm:$0xf] %vm562_vm0, %v670_v26  ;;  %v570_v31 = vadd.f32 %v569_v29, %v568_v27  ;;  %v592_v42 = vsel %vm567_vm1, %v586_v34, 0.0 }
 0x11e   :  { %564 = vst.msk [vmem:[%s1018_s2 + $0x4] sm:$0xf] %vm562_vm0, %v668_v28  ;;  %v588_v35 = vsel %vm567_vm1, %v584_v30, 0.0 }
 0x11f   :  { %v572_v36 = vadd.f32 %v571_v32, %v570_v31  ;;  %v589_v37 = vadd.f32 %v588_v35, %v587_v33 }
 0x121   :  { %v574_v40 = vadd.f32 %v573_v39, %v572_v36  ;;  %v591_v41 = vadd.f32 %v590_v38, %v589_v37 }
 0x123   :  { %v575_v43 = vrot.slane %v574_v40, 4  ;;  %v593_v44 = vadd.f32 %v592_v42, %v591_v41 }
 0x125   :  { %v576_v45 = vadd.f32 %v575_v43, %v574_v40  ;;  %v594_v46 = vrot.slane %v593_v44, 4 }
 0x127   :  { %v577_v47 = vrot.slane %v576_v45, 2  ;;  %v595_v48 = vadd.f32 %v594_v46, %v593_v44 }
 0x129   :  { %v578_v49 = vadd.f32 %v577_v47, %v576_v45  ;;  %v596_v50 = vrot.slane %v595_v48, 2 }
 0x12b   :  { %v579_v51 = vrot.slane %v578_v49, 1  ;;  %v597_v52 = vadd.f32 %v596_v50, %v595_v48 }
 0x12d   :  { %v580_v53 = vadd.f32 %v579_v51, %v578_v49  ;;  %v598_v54 = vrot.slane %v597_v52, 1 }
 0x12f   :  { %582 = vst.msk [vmem:[%s1019_s3] sm:$0x1] %vm581_vm2, %v580_v53  ;;  %v599_v55 = vadd.f32 %v598_v54, %v597_v52 }
 0x131   :  { %600 = vst.msk [vmem:[%s1020_s4] sm:$0x1] %vm581_vm2, %v599_v55 }

// kernel: spatial_path.12
= control target key start
LH: loop header
LB: loop body
LE: loop exit
PB: predicated region body
PF: predicated region fallthrough
CT: control target
= control target key end

     0   :  { %v708_v34 = vmov 0.0   ;;  %vm709_vm0 = vmmov 0   ;;  %vm498_vm1 = vcmask 519168   ;;  %vm501_vm2 = vcmask 523264   ;;  %s882_s1 = inlined_call_operand.vmem [shape: bf16[640,64], index: 1, kind: input, shape index: {}]   ;;  %s883_s0 = inlined_call_operand.vmem [shape: bf16[16,640], index: 0, kind: input, shape index: {}]   ;;  %s884_s2 = inlined_call_operand.vmem [shape: bf16[16,64], index: 2, kind: output, shape index: {0}]   ;;  %s885_s3 = inlined_call_operand.vmem [shape: f32[1,1,64], index: 3, kind: output, shape index: {1}]   ;;  %s886_s4 = inlined_call_operand.vmem [shape: f32[1,1,64], index: 4, kind: output, shape index: {2}]  }
   0x1   :  { %v661_v0 = vld [vmem:[%s882_s1 + $0x40] sm:$0xff]   ;;  %v665_v4 = vld [vmem:[%s882_s1 + $0x48] sm:$0xff]   ;;  %v669_v8 = vld [vmem:[%s882_s1 + $0x50] sm:$0xff]   ;;  %vm511_vm3 = vcmask 516096  }
   0x2   :  { %v662_v1 = vld [vmem:[%s882_s1 + $0xc0] sm:$0xff]   ;;  %586 = vmatprep.subr.bf16.mxu0 %v661_v0  ;;  %v666_v5 = vld [vmem:[%s882_s1 + $0xc8] sm:$0xff]   ;;  %v670_v9 = vld [vmem:[%s882_s1 + $0xd0] sm:$0xff]  }
   0x3   :  { %v663_v2 = vld [vmem:[%s882_s1] sm:$0xff]   ;;  %608 = vmatprep.subr.bf16.mxu1 %v662_v1  ;;  %v667_v6 = vld [vmem:[%s882_s1 + $0x8] sm:$0xff]   ;;  %v671_v10 = vld [vmem:[%s882_s1 + $0x10] sm:$0xff]  }
   0x4   :  { %v664_v3 = vld [vmem:[%s882_s1 + $0x80] sm:$0xff]   ;;  %587 = vmatpush3.bf16.msra.mxu0 %v663_v2  ;;  %v668_v7 = vld [vmem:[%s882_s1 + $0x88] sm:$0xff]   ;;  %v672_v11 = vld [vmem:[%s882_s1 + $0x90] sm:$0xff]  }
   0x5   :  { %609 = vmatpush3.bf16.msra.mxu1 %v664_v3  ;;  %588 = vmatprep.subr.bf16.mxu0 %v665_v4  ;;  %v673_v12 = vld [vmem:[%s882_s1 + $0x58] sm:$0xff]   ;;  %v677_v16 = vld [vmem:[%s882_s1 + $0x60] sm:$0xff]   ;;  %v681_v20 = vld [vmem:[%s882_s1 + $0x68] sm:$0xff]  }
   0x6   :  { %610 = vmatprep.subr.bf16.mxu1 %v666_v5  ;;  %v674_v13 = vld [vmem:[%s882_s1 + $0xd8] sm:$0xff]   ;;  %v678_v17 = vld [vmem:[%s882_s1 + $0xe0] sm:$0xff]   ;;  %v682_v21 = vld [vmem:[%s882_s1 + $0xe8] sm:$0xff]  }
   0x7   :  { %v675_v14 = vld [vmem:[%s882_s1 + $0x18] sm:$0xff]   ;;  %v679_v18 = vld [vmem:[%s882_s1 + $0x20] sm:$0xff]   ;;  %v683_v22 = vld [vmem:[%s882_s1 + $0x28] sm:$0xff]  }
   0x8   :  { %589 = vmatpush3.bf16.msra.mxu0 %v667_v6  ;;  %v676_v15 = vld [vmem:[%s882_s1 + $0x98] sm:$0xff]   ;;  %v680_v19 = vld [vmem:[%s882_s1 + $0xa0] sm:$0xff]   ;;  %v684_v23 = vld [vmem:[%s882_s1 + $0xa8] sm:$0xff]  }
   0x9   :  { %611 = vmatpush3.bf16.msra.mxu1 %v668_v7  ;;  %590 = vmatprep.subr.bf16.mxu0 %v669_v8  ;;  %v685_v24 = vld [vmem:[%s882_s1 + $0x70] sm:$0xff]   ;;  %v689_v28 = vld [vmem:[%s882_s1 + $0x78] sm:$0xff]   ;;  %v698_v36 = vld [vmem:[%s883_s0 + $0xc] ss:$20 sps:$4 sm:$0xff]  }
   0xa   :  { %612 = vmatprep.subr.bf16.mxu1 %v670_v9  ;;  %v686_v25 = vld [vmem:[%s882_s1 + $0xf0] sm:$0xff]   ;;  %v690_v29 = vld [vmem:[%s882_s1 + $0xf8] sm:$0xff]   ;;  %v699_v37 = vld [vmem:[%s882_s1 + $0x100] sm:$0xff]   ;;  %440 = vmatprep.mubr.bf16.mxu1 %v698_v36 }
   0xb   :  { %v687_v26 = vld [vmem:[%s882_s1 + $0x30] sm:$0xff]   ;;  %v691_v30 = vld [vmem:[%s882_s1 + $0x38] sm:$0xff]   ;;  %v700_v38 = vld [vmem:[%s882_s1 + $0x108] sm:$0xff]  }
   0xc   :  { %591 = vmatpush3.bf16.msra.mxu0 %v671_v10  ;;  %v688_v27 = vld [vmem:[%s882_s1 + $0xb0] sm:$0xff]   ;;  %v692_v31 = vld [vmem:[%s882_s1 + $0xb8] sm:$0xff]   ;;  %v703_v41 = vld [vmem:[%s882_s1 + $0x120] sm:$0xff]  }
   0xd   :  { %613 = vmatpush3.bf16.msra.mxu1 %v672_v11  ;;  %592 = vmatprep.subr.bf16.mxu0 %v673_v12  ;;  %v693_v32 = vld [vmem:[%s883_s0] ss:$20 sps:$4 sm:$0xff]   ;;  %v695_v33 = vld [vmem:[%s883_s0 + $0x4] ss:$20 sps:$4 sm:$0xff]   ;;  %v696_v35 = vld [vmem:[%s883_s0 + $0x8] ss:$20 sps:$4 sm:$0xff]  }
   0xe   :  { %614 = vmatprep.subr.bf16.mxu1 %v674_v13  ;;  %399 = vmatprep.mubr.bf16.mxu0 %v695_v33  ;;  %v701_v39 = vld [vmem:[%s882_s1 + $0x110] sm:$0xff]   ;;  %v702_v40 = vld [vmem:[%s882_s1 + $0x118] sm:$0xff]   ;;  %v704_v42 = vld [vmem:[%s882_s1 + $0x128] sm:$0xff]  }
   0xf   :  { %v705_v43 = vld [vmem:[%s882_s1 + $0x130] sm:$0xff]   ;;  %v706_v44 = vld [vmem:[%s882_s1 + $0x138] sm:$0xff]  }
  0x10   :  { %593 = vmatpush3.bf16.msra.mxu0 %v675_v14  ;;  %v707_v45 = vld [vmem:[%s883_s0 + $0x10] ss:$20 sps:$4 sm:$0xff]  }
  0x11   :  { %615 = vmatpush3.bf16.msra.mxu1 %v676_v15  ;;  %594 = vmatprep.subr.bf16.mxu0 %v677_v16 }
  0x12   :  { %616 = vmatprep.subr.bf16.mxu1 %v678_v17 }
  0x14   :  { %595 = vmatpush3.bf16.msra.mxu0 %v679_v18 }
  0x15   :  { %617 = vmatpush3.bf16.msra.mxu1 %v680_v19  ;;  %596 = vmatprep.subr.bf16.mxu0 %v681_v20 }
  0x16   :  { %618 = vmatprep.subr.bf16.mxu1 %v682_v21 }
  0x18   :  { %597 = vmatpush3.bf16.msra.mxu0 %v683_v22 }
  0x19   :  { %619 = vmatpush3.bf16.msra.mxu1 %v684_v23  ;;  %598 = vmatprep.subr.bf16.mxu0 %v685_v24 }
  0x1a   :  { %620 = vmatprep.subr.bf16.mxu1 %v686_v25 }
  0x1c   :  { %599 = vmatpush3.bf16.msra.mxu0 %v687_v26 }
  0x1d   :  { %621 = vmatpush3.bf16.msra.mxu1 %v688_v27  ;;  %600 = vmatprep.subr.bf16.mxu0 %v689_v28 }
  0x1e   :  { %622 = vmatprep.subr.bf16.mxu1 %v690_v29 }
  0x20   :  { %601 = vmatpush3.bf16.msra.mxu0 %v691_v30 }
  0x21   :  { %623 = vmatpush3.bf16.msra.mxu1 %v692_v31  ;;  %639 = vmatprep.subr.bf16.mxu0 %v708_v34 }
  0x23   :  { %400 = vmatmul.mubr.bf16.vlgmr.msra.gmra.mrb[0].mxu0 %v693_v32 }
  0x24   :  { %441 = vmatmul.mubr.bf16.vlgmr.msra.gmra.mrb[0].mxu1 %v696_v35  ;;  %640 = vmatpush3.bf16.msra.mxu0 %v699_v37 }
  0x25   :  { %641 = vmatprep.subr.bf16.mxu0 %v708_v34  ;;  %655 = vmatprep.mubr.msk.bf16.mxu0 %vm709_vm0, %v708_v34 }
  0x28   :  { %642 = vmatpush3.bf16.msra.mxu0 %v700_v38 }
  0x29   :  { %643 = vmatprep.subr.bf16.mxu0 %v708_v34 }
  0x2c   :  { %644 = vmatpush3.bf16.msra.mxu0 %v701_v39 }
  0x2d   :  { %645 = vmatprep.subr.bf16.mxu0 %v708_v34 }
  0x30   :  { %646 = vmatpush3.bf16.msra.mxu0 %v702_v40 }
  0x31   :  { %647 = vmatprep.subr.bf16.mxu0 %v708_v34 }
  0x34   :  { %648 = vmatpush3.bf16.msra.mxu0 %v703_v41 }
  0x35   :  { %649 = vmatprep.subr.bf16.mxu0 %v708_v34 }
  0x38   :  { %650 = vmatpush3.bf16.msra.mxu0 %v704_v42 }
  0x39   :  { %651 = vmatprep.subr.bf16.mxu0 %v708_v34 }
  0x3c   :  { %652 = vmatpush3.bf16.msra.mxu0 %v705_v43 }
  0x3d   :  { %653 = vmatprep.subr.bf16.mxu0 %v708_v34 }
  0x40   :  { %654 = vmatpush3.bf16.msra.mxu0 %v706_v44 }
  0x43   :  { %656 = vmatmul.mubr.bf16.vlgmr.msra.gmra.mrb[4].mxu0 %v707_v45 }
  0xf6   :  { %v602_v46 = vpop.f32.mrb[0].mxu0 }
  0xf7   :  { %v624_v47 = vpop.f32.mrb[0].mxu1  ;;  %v603_v48 = vpop.f32.mrb[1].mxu0 }
  0xf8   :  { %v604_v49 = vadd.f32 %v603_v48, %v602_v46  ;;  %v625_v50 = vpop.f32.mrb[1].mxu1  ;;  %v605_v51 = vpop.f32.mrb[2].mxu0 }
  0xf9   :  { %v626_v52 = vadd.f32 %v625_v50, %v624_v47  ;;  %v627_v53 = vpop.f32.mrb[2].mxu1  ;;  %v606_v54 = vpop.f32.mrb[3].mxu0 }
  0xfa   :  { %v607_v55 = vadd.f32 %v606_v54, %v605_v51  ;;  %v628_v56 = vpop.f32.mrb[3].mxu1 }
  0xfb   :  { %v629_v57 = vadd.f32 %v628_v56, %v627_v53  ;;  %v443_v58 = vadd.f32 %v626_v52, %v604_v49 }
  0xfd   :  { %v446_v59 = vadd.f32 %v629_v57, %v607_v55 }
 0x116   :  { %v483_v60 = vpop.f32.mrb[4].mxu0 }
 0x117   :  { %v484_v61 = vadd.f32 %v483_v60, %v443_v58  ;;  %v657_v62 = vpop.f32.mrb[5].mxu0 }
 0x118   :  { %v486_v63 = vpop.f32.mrb[6].mxu0 }
 0x119   :  { %v584_v0 = vpack.c.bf16 %v484_v61, %v484_v61  ;;  %v513_v1 = vmul.f32 %v484_v61, %v484_v61  ;;  %v487_v2 = vadd.f32 %v486_v63, %v446_v59  ;;  %v658_v3 = vpop.f32.mrb[7].mxu0  ;;  %v502_v4 = vsel %vm501_vm2, %v484_v61, 0.0 }
 0x11b   :  { %499 = vst.msk [vmem:[%s884_s2] sm:$0xf] %vm498_vm1, %v584_v0  ;;  %v585_v5 = vpack.c.bf16 %v487_v2, %v487_v2  ;;  %v503_v6 = vsel %vm501_vm2, %v487_v2, 0.0  ;;  %v514_v7 = vmul.f32 %v487_v2, %v487_v2  ;;  %v515_v9 = vsel %vm501_vm2, %v513_v1, 0.0 }
 0x11c   :  { %v504_v8 = vadd.f32 %v503_v6, %v502_v4 }
 0x11d   :  { %500 = vst.msk [vmem:[%s884_s2 + $0x4] sm:$0xf] %vm498_vm1, %v585_v5  ;;  %v516_v10 = vsel %vm501_vm2, %v514_v7, 0.0 }
 0x11e   :  { %v505_v11 = vrot.slane %v504_v8, 4  ;;  %v517_v12 = vadd.f32 %v516_v10, %v515_v9 }
 0x120   :  { %v506_v13 = vadd.f32 %v505_v11, %v504_v8  ;;  %v518_v14 = vrot.slane %v517_v12, 4 }
 0x122   :  { %v507_v15 = vrot.slane %v506_v13, 2  ;;  %v519_v16 = vadd.f32 %v518_v14, %v517_v12 }
 0x124   :  { %v508_v17 = vadd.f32 %v507_v15, %v506_v13  ;;  %v520_v18 = vrot.slane %v519_v16, 2 }
 0x126   :  { %v509_v19 = vrot.slane %v508_v17, 1  ;;  %v521_v20 = vadd.f32 %v520_v18, %v519_v16 }
 0x128   :  { %v510_v21 = vadd.f32 %v509_v19, %v508_v17  ;;  %v522_v22 = vrot.slane %v521_v20, 1 }
 0x12a   :  { %512 = vst.msk [vmem:[%s885_s3] sm:$0x1] %vm511_vm3, %v510_v21  ;;  %v523_v23 = vadd.f32 %v522_v22, %v521_v20 }
 0x12c   :  { %524 = vst.msk [vmem:[%s886_s4] sm:$0x1] %vm511_vm3, %v523_v23 }

// kernel: spatial_path.13
= control target key start
LH: loop header
LB: loop body
LE: loop exit
PB: predicated region body
PF: predicated region fallthrough
CT: control target
= control target key end

     0   :  { %s73_s0 = inlined_call_operand.vmem [shape: bf16[8,128], index: 0, kind: input, shape index: {}]   ;;  %s74_s1 = inlined_call_operand.vmem [shape: f32[1,128], index: 1, kind: input, shape index: {}]   ;;  %s75_s2 = inlined_call_operand.vmem [shape: f32[1,128], index: 2, kind: input, shape index: {}]   ;;  %s76_s3 = inlined_call_operand.vmem [shape: bf16[8,128], index: 3, kind: output, shape index: {}]  }
   0x1   :  { %v14_v0 = vld [vmem:[%s73_s0] sm:$0xf] }
   0x2   :  { %v39_v1 = vld [vmem:[%s74_s1] ss:$0 sm:$0xff]  ;;  %v15_v2 = vunpack.c.l.bf16 %v14_v0 }
   0x3   :  { %v40_v3 = vld [vmem:[%s75_s2] ss:$0 sm:$0xff] }
   0x4   :  { %v23_v4 = vmul.f32 %v39_v1, %v15_v2 }
   0x6   :  { %v31_v5 = vadd.f32 %v40_v3, %v23_v4 }
   0x8   :  { %v32_v6 = vmax.f32 %v31_v5, 0.0 }
   0xa   :  { %v33_v7 = vpack.c.bf16 %v32_v6, %v32_v6 }
   0xc   :  { %34 = vst [vmem:[%s76_s3] sm:$0xf] %v33_v7 }

// kernel: spatial_path.14
= control target key start
LH: loop header
LB: loop body
LE: loop exit
PB: predicated region body
PF: predicated region fallthrough
CT: control target
= control target key end

     0   :  { %v180_v0 = vmov 0.0   ;;  %vm181_vm0 = vmmov 0   ;;  %vm54_vm1 = vcmask 523264   ;;  %vm107_vm2 = vcmask 257024   ;;  %s234_s1 = inlined_call_operand.vmem [shape: bf16[64,32], index: 1, kind: input, shape index: {}]   ;;  %s235_s0 = inlined_call_operand.vmem [shape: bf16[16,64], index: 0, kind: input, shape index: {}]   ;;  %s236_s2 = inlined_call_operand.vmem [shape: bf16[16,32], index: 2, kind: output, shape index: {0}]   ;;  %s237_s3 = inlined_call_operand.vmem [shape: f32[1,1,32], index: 3, kind: output, shape index: {1}]   ;;  %s238_s4 = inlined_call_operand.vmem [shape: f32[1,1,32], index: 4, kind: output, shape index: {2}]  }
   0x1   :  { %161 = vmatprep.subr.bf16.mxu0 %v180_v0  ;;  %v175_v1 = vld [vmem:[%s234_s1] sm:$0xff]   ;;  %169 = vmatprep.mubr.msk.bf16.mxu0 %vm181_vm0, %v180_v0  ;;  %v176_v2 = vld [vmem:[%s234_s1 + $0x8] sm:$0xff]   ;;  %v177_v3 = vld [vmem:[%s234_s1 + $0x10] sm:$0xff]   ;;  %vm110_vm3 = vcmask 261120   ;;  %vm120_vm4 = vcmask 253952  }
   0x2   :  { %162 = vmatpush3.bf16.msra.mxu0 %v175_v1  ;;  %v178_v4 = vld [vmem:[%s234_s1 + $0x18] sm:$0xff]   ;;  %v179_v5 = vld [vmem:[%s235_s0] sm:$0xff]  }
   0x3   :  { %163 = vmatprep.subr.bf16.mxu0 %v180_v0 }
   0x6   :  { %164 = vmatpush3.bf16.msra.mxu0 %v176_v2 }
   0x7   :  { %165 = vmatprep.subr.bf16.mxu0 %v180_v0 }
   0xa   :  { %166 = vmatpush3.bf16.msra.mxu0 %v177_v3 }
   0xb   :  { %167 = vmatprep.subr.bf16.mxu0 %v180_v0 }
   0xe   :  { %168 = vmatpush3.bf16.msra.mxu0 %v178_v4 }
  0x11   :  { %170 = vmatmul.mubr.msk.bf16.vlgmr.msra.gmra.mrb[0].mxu0 %vm54_vm1, %v179_v5 }
  0xe4   :  { %v92_v6 = vpop.f32.mrb[0].mxu0 }
  0xe5   :  { %v154_v7 = vpack.c.bf16 %v92_v6, %v92_v6  ;;  %v122_v8 = vmul.f32 %v92_v6, %v92_v6  ;;  %v171_v9 = vpop.f32.mrb[1].mxu0  ;;  %v111_v11 = vsel %vm110_vm3, %v92_v6, 0.0 }
  0xe6   :  { %v95_v10 = vpop.f32.mrb[2].mxu0 }
  0xe7   :  { %108 = vst.msk [vmem:[%s236_s2] sm:$0xf] %vm107_vm2, %v154_v7  ;;  %v155_v12 = vpack.c.bf16 %v95_v10, %v95_v10  ;;  %v112_v13 = vsel %vm110_vm3, %v95_v10, 0.0  ;;  %v123_v14 = vmul.f32 %v95_v10, %v95_v10  ;;  %v172_v15 = vpop.f32.mrb[3].mxu0  ;;  %v124_v17 = vsel %vm110_vm3, %v122_v8, 0.0 }
  0xe8   :  { %v113_v16 = vadd.f32 %v112_v13, %v111_v11 }
  0xe9   :  { %109 = vst.msk [vmem:[%s236_s2 + $0x4] sm:$0xf] %vm107_vm2, %v155_v12  ;;  %v125_v18 = vsel %vm110_vm3, %v123_v14, 0.0 }
  0xea   :  { %v114_v19 = vrot.slane %v113_v16, 4  ;;  %v126_v20 = vadd.f32 %v125_v18, %v124_v17 }
  0xec   :  { %v115_v21 = vadd.f32 %v114_v19, %v113_v16  ;;  %v127_v22 = vrot.slane %v126_v20, 4 }
  0xee   :  { %v116_v23 = vrot.slane %v115_v21, 2  ;;  %v128_v24 = vadd.f32 %v127_v22, %v126_v20 }
  0xf0   :  { %v117_v25 = vadd.f32 %v116_v23, %v115_v21  ;;  %v129_v26 = vrot.slane %v128_v24, 2 }
  0xf2   :  { %v118_v27 = vrot.slane %v117_v25, 1  ;;  %v130_v28 = vadd.f32 %v129_v26, %v128_v24 }
  0xf4   :  { %v119_v29 = vadd.f32 %v118_v27, %v117_v25  ;;  %v131_v30 = vrot.slane %v130_v28, 1 }
  0xf6   :  { %121 = vst.msk [vmem:[%s237_s3] sm:$0x1] %vm120_vm4, %v119_v29  ;;  %v132_v31 = vadd.f32 %v131_v30, %v130_v28 }
  0xf8   :  { %133 = vst.msk [vmem:[%s238_s4] sm:$0x1] %vm120_vm4, %v132_v31 }

// kernel: spatial_path.15
= control target key start
LH: loop header
LB: loop body
LE: loop exit
PB: predicated region body
PF: predicated region fallthrough
CT: control target
= control target key end

     0   :  { %s73_s0 = inlined_call_operand.vmem [shape: bf16[4,128], index: 0, kind: input, shape index: {}]   ;;  %s74_s1 = inlined_call_operand.vmem [shape: f32[1,128], index: 1, kind: input, shape index: {}]   ;;  %s75_s2 = inlined_call_operand.vmem [shape: f32[1,128], index: 2, kind: input, shape index: {}]   ;;  %s76_s3 = inlined_call_operand.vmem [shape: bf16[4,128], index: 3, kind: output, shape index: {}]  }
   0x1   :  { %v14_v0 = vld [vmem:[%s73_s0] sm:$0x3] }
   0x2   :  { %v39_v1 = vld [vmem:[%s74_s1] ss:$0 sm:$0xff]  ;;  %v15_v2 = vunpack.c.l.bf16 %v14_v0 }
   0x3   :  { %v40_v3 = vld [vmem:[%s75_s2] ss:$0 sm:$0xff] }
   0x4   :  { %v23_v4 = vmul.f32 %v39_v1, %v15_v2 }
   0x6   :  { %v31_v5 = vadd.f32 %v40_v3, %v23_v4 }
   0x8   :  { %v32_v6 = vmax.f32 %v31_v5, 0.0 }
   0xa   :  { %v33_v7 = vpack.c.bf16 %v32_v6, %v32_v6 }
   0xc   :  { %34 = vst [vmem:[%s76_s3] sm:$0x3] %v33_v7 }

</bundles_post_ra>
